<compile_context>
chip_gen: v5e
topology: v5e:2x2
jax: 0.10.0
libtpu: 0.0.40
codegen_flags: <defaults>
</compile_context>

<pallas_src>
import functools

import numpy as np
import jax
import jax.numpy as jnp
from jax.experimental import pallas as pl
from jax.experimental.pallas import tpu as pltpu


def _leaky_relu(x, negative_slope=0.2):
    # TODO(synk): create_activation() source not provided; assuming LeakyReLU(0.2).
    return jnp.where(x >= 0, x, negative_slope * x)


def _round_up(x, m):
    return (x + m - 1) // m * m


def _cdiv(a, b):
    return (a + b - 1) // b


# ----------------------------- kernel ---------------------------------------

def mlp_disc_kernel(x_ref,
                    w1_ref, b1_ref, wr1_ref, br1_ref,
                    w2_ref, b2_ref, wr2_ref, br2_ref,
                    wo_ref, bo_ref,
                    o_ref,
                    *, residual_weight, row_splits):
    """Fused 5-matmul MLP discriminator forward for one batch tile.

    Weights are bf16 (pre-cast once, outside the forward path); the f32 x tile
    is cast to bf16 in-kernel right before the first dot.  Accumulation and all
    VPU epilogue work (bias add, leaky_relu, residual) stay in f32.

    `row_splits` is a static tuple of sub-tile row counts: when the batch tile
    has >= 32 rows it is split into two independent chains so the LLO scheduler
    can overlap one half's MXU matmuls with the other half's VPU epilogue.
    """
    cdt = w1_ref.dtype  # matmul operand dtype (bfloat16)

    def _residual(t, h):
        # TODO(synk): LinearResidual source not provided; implementing
        # y = residual_weight * transform(x) + x.  residual_weight is a
        # compile-time Python float, so the multiply is elided when it is 1.0.
        if residual_weight == 1.0:
            return t + h
        return residual_weight * t + h

    def chain(x_f32):
        # block 1: SN-Linear(in_dim -> H1) + LinearResidual
        h = jnp.dot(x_f32.astype(cdt), w1_ref[...],
                    preferred_element_type=jnp.float32) + b1_ref[...]
        t = jnp.dot(h.astype(cdt), wr1_ref[...],
                    preferred_element_type=jnp.float32) + br1_ref[...]
        h = _residual(_leaky_relu(t), h)
        # block 2: SN-Linear(H1 -> H2) + LinearResidual
        h = jnp.dot(h.astype(cdt), w2_ref[...],
                    preferred_element_type=jnp.float32) + b2_ref[...]
        t = jnp.dot(h.astype(cdt), wr2_ref[...],
                    preferred_element_type=jnp.float32) + br2_ref[...]
        h = _residual(_leaky_relu(t), h)
        # output head: Linear(H2 -> out_dim padded to 128 lanes), no SN
        return (jnp.dot(h.astype(cdt), wo_ref[...],
                        preferred_element_type=jnp.float32) + bo_ref[...])

    off = 0
    for rows in row_splits:          # static unroll, single basic block
        out = chain(x_ref[pl.ds(off, rows), :])
        o_ref[pl.ds(off, rows), :] = out.astype(o_ref.dtype)
        off += rows


# ------------------------ hoisted parameter prep ----------------------------

def prepare_params(params, *, compute_dtype=jnp.bfloat16):
    """One-time parameter prep (call once, NOT per forward):
      * spectral norm assumed already folded into the weights,
      * weights cast to the MXU compute dtype (bf16), biases kept f32,
      * w1 K-rows padded to a multiple of 128 (lane-aligned first matmul),
      * output head padded to >= 128 lanes (unmasked vst / wide writeback DMA).
    """
    in_dim = params["w1"].shape[0]
    in_dim_pad = _round_up(in_dim, 128)
    out_dim = params["wo"].shape[1]
    out_pad = max(128, _round_up(out_dim, 128))

    w1 = params["w1"]
    if in_dim_pad != in_dim:
        w1 = jnp.pad(w1, ((0, in_dim_pad - in_dim), (0, 0)))
    wo = jnp.pad(params["wo"], ((0, 0), (0, out_pad - out_dim)))
    bo = jnp.pad(params["bo"], ((0, 0), (0, out_pad - out_dim)))

    cast = lambda a: jnp.asarray(a, compute_dtype)
    f32 = lambda a: jnp.asarray(a, jnp.float32)
    # TODO(synk): on v7x the fp8 MXU (compute_dtype=float8_e4m3fn) would halve
    # weight HBM/VMEM again; not drop-in -- validate discriminator logits first.
    return dict(
        w1=cast(w1), b1=f32(params["b1"]),
        wr1=cast(params["wr1"]), br1=f32(params["br1"]),
        w2=cast(params["w2"]), b2=f32(params["b2"]),
        wr2=cast(params["wr2"]), br2=f32(params["br2"]),
        wo=cast(wo), bo=f32(bo),
        in_dim=in_dim, in_dim_pad=in_dim_pad,
        out_dim=out_dim, out_pad=out_pad,
    )


# ------------------------------ forward -------------------------------------

_VMEM_SOFT_CAP = 44 * 1024 * 1024   # stay well under v7x's 64 MiB physical VMEM


def mlp_discriminator(x_nchw, prepped, residual_weight=1.0, *, block_m=512):
    """Forward pass.  `prepped` comes from prepare_params (weights already cast
    and padded); x is NCHW, flattened like torch's x.view(x.shape[0], -1)."""
    B = x_nchw.shape[0]
    x2d = x_nchw.reshape(B, -1).astype(jnp.float32)   # bf16 cast happens in-kernel
    in_dim, in_dim_pad = prepped["in_dim"], prepped["in_dim_pad"]
    out_dim, out_pad = prepped["out_dim"], prepped["out_pad"]
    assert x2d.shape[1] == in_dim, (x2d.shape, in_dim)
    if in_dim_pad != in_dim:
        x2d = jnp.pad(x2d, ((0, 0), (0, in_dim_pad - in_dim)))

    weight_args = (prepped["w1"], prepped["b1"], prepped["wr1"], prepped["br1"],
                   prepped["w2"], prepped["b2"], prepped["wr2"], prepped["br2"],
                   prepped["wo"], prepped["bo"])
    resident_bytes = sum(int(a.size) * a.dtype.itemsize for a in weight_args)

    # --- batch tile selection ------------------------------------------------
    #  * multiple of 16 sublanes (bf16 intermediates are (16,128)-packed)
    #  * minimal padding: TM ~= ceil(B / n_tiles) instead of rounding B up to
    #    a full multiple of block_m
    #  * >= 2 grid steps once B >= 32 so v7x's two TensorCores both get work
    #  * shrink TM until the VMEM footprint fits the soft cap
    min_tiles = 2 if B >= 32 else 1
    n_tiles = max(_cdiv(B, block_m), min_tiles)
    TM = _round_up(_cdiv(B, n_tiles), 16)

    def footprint(tm):
        return (resident_bytes                                   # single-buffered
                + 2 * tm * in_dim_pad * x2d.dtype.itemsize       # x, double-buffered
                + 2 * tm * out_pad * 4)                          # out, double-buffered

    while footprint(TM) > _VMEM_SOFT_CAP and TM > 16:
        TM = max(16, (TM // 2) // 16 * 16)
    # TODO(synk): if even TM=16 overflows (in_dim >~ 150k on v7x), K-tile the
    # first matmul with an "arbitrary" grid axis + f32 acc scratch instead.

    n_tiles = _cdiv(B, TM)
    B_pad = n_tiles * TM
    if B_pad != B:
        x2d = jnp.pad(x2d, ((0, B_pad - B), (0, 0)))

    # Two independent >=16-row chains per tile -> MXU/VPU overlap inside a step.
    if TM >= 32:
        half = (TM // 2) // 16 * 16
        row_splits = (half, TM - half)
    else:
        row_splits = (TM,)

    H1 = prepped["w1"].shape[1]
    H2 = prepped["w2"].shape[1]
    flops = 2 * B_pad * (in_dim_pad * H1 + H1 * H1 + H1 * H2 + H2 * H2
                         + H2 * out_pad)
    bytes_accessed = int(B_pad * in_dim_pad * 4 + resident_bytes
                         + B_pad * out_pad * 4)
    vmem_limit = int(min(max(footprint(TM) + (8 << 20), 32 << 20), 60 << 20))

    kernel = functools.partial(mlp_disc_kernel,
                               residual_weight=float(residual_weight),
                               row_splits=row_splits)

    def _resident_spec(a, single_buffer):
        # Constant index map -> stays VMEM-resident across the whole grid.
        if single_buffer:
            # Never re-fetched, so no prefetch buffer needed.
            return pl.BlockSpec(a.shape, lambda i: (0, 0),
                                pipeline_mode=pl.Buffered(1))
        return pl.BlockSpec(a.shape, lambda i: (0, 0))

    def build_and_call(single_buffer_weights):
        in_specs = [pl.BlockSpec((TM, in_dim_pad), lambda i: (i, 0))]
        in_specs += [_resident_spec(a, single_buffer_weights) for a in weight_args]
        return pl.pallas_call(
            kernel,
            out_shape=jax.ShapeDtypeStruct((B_pad, out_pad), jnp.float32),
            grid=(n_tiles,),
            in_specs=in_specs,
            out_specs=pl.BlockSpec((TM, out_pad), lambda i: (i, 0)),
            compiler_params=pltpu.CompilerParams(
                dimension_semantics=("parallel",),
                vmem_limit_bytes=vmem_limit),
            cost_estimate=pl.CostEstimate(flops=int(flops), transcendentals=0,
                                          bytes_accessed=bytes_accessed),
        )(x2d, *weight_args)

    try:
        out = build_and_call(single_buffer_weights=True)
    except Exception:
        # Fallback: default double-buffered resident weights (costs VMEM only).
        out = build_and_call(single_buffer_weights=False)

    return out[:B, :out_dim]


# ---------------- parameter setup (plain-JAX glue, one-time) ----------------

def _linear_params(key, fan_in, fan_out, bias=True):
    """PyTorch-style Linear init, weight stored transposed as (in, out)."""
    kw, kb = jax.random.split(key)
    bound = 1.0 / float(np.sqrt(fan_in))
    w = jax.random.uniform(kw, (fan_in, fan_out), jnp.float32, -bound, bound)
    if bias:
        b = jax.random.uniform(kb, (1, fan_out), jnp.float32, -bound, bound)
    else:
        b = jnp.zeros((1, fan_out), jnp.float32)
    return w, b


def _spectral_normalize(w, key, n_iter=10, eps=1e-12):
    """weight / sigma_max(weight), matching nn.utils.spectral_norm at eval.
    # TODO(synk): torch stores/updates `u` as a buffer; here a fresh 10-step
    # power iteration runs once at parameter-prep time (hoisted out of the
    # forward path), so sigma may differ slightly from a torch checkpoint."""
    u = jax.random.normal(key, (w.shape[1],), jnp.float32)
    v = None
    for _ in range(n_iter):
        v = w @ u
        v = v / (jnp.linalg.norm(v) + eps)
        u = w.T @ v
        u = u / (jnp.linalg.norm(u) + eps)
    sigma = v @ (w @ u)
    return w / sigma


if __name__ == "__main__":
    key = jax.random.PRNGKey(0)
    keys = jax.random.split(key, 12)

    # args: in_dim = C*H*W, hidden_list = [in_dim, 128, 128], out_dim = 8,
    #       has_bias = True, residual weight = 1.0, activation = LeakyReLU(0.2)
    B, C, H, W = 2, 4, 16, 16
    in_dim = C * H * W                      # 1024
    hidden_list = [in_dim, 128, 128]
    out_dim = 8
    has_bias = True
    residual_weight = 1.0

    x = jax.random.normal(keys[0], (B, C, H, W), jnp.float32)

    H1, H2 = hidden_list[1], hidden_list[2]
    w1, b1 = _linear_params(keys[1], in_dim, H1)
    w1 = _spectral_normalize(w1, keys[2])
    wr1, br1 = _linear_params(keys[3], H1, H1, bias=has_bias)
    wr1 = _spectral_normalize(wr1, keys[4])

    w2, b2 = _linear_params(keys[5], H1, H2)
    w2 = _spectral_normalize(w2, keys[6])
    wr2, br2 = _linear_params(keys[7], H2, H2, bias=has_bias)
    wr2 = _spectral_normalize(wr2, keys[8])

    wo, bo = _linear_params(keys[9], H2, out_dim)   # final Linear has no SN

    params = dict(w1=w1, b1=b1, wr1=wr1, br1=br1,
                  w2=w2, b2=b2, wr2=wr2, br2=br2,
                  wo=wo, bo=bo)

    # Hoisted, one-time prep (bf16 casts, K/lane padding).
    prepped = jax.tree_util.tree_map(
        jax.block_until_ready, prepare_params(params))

    out = mlp_discriminator(x, prepped, residual_weight=residual_weight)
    out = jax.block_until_ready(out)
    assert out.shape == (B, out_dim), out.shape

    # pure-JAX reference mirroring the kernel's bf16-operand / f32-accumulate math
    def ref(xin):
        bf = jnp.bfloat16
        h0 = xin.reshape(B, -1)
        h = jnp.dot(h0.astype(bf), w1.astype(bf),
                    preferred_element_type=jnp.float32) + b1
        t = jnp.dot(h.astype(bf), wr1.astype(bf),
                    preferred_element_type=jnp.float32) + br1
        h = residual_weight * _leaky_relu(t) + h
        h = jnp.dot(h.astype(bf), w2.astype(bf),
                    preferred_element_type=jnp.float32) + b2
        t = jnp.dot(h.astype(bf), wr2.astype(bf),
                    preferred_element_type=jnp.float32) + br2
        h = residual_weight * _leaky_relu(t) + h
        return jnp.dot(h.astype(bf), wo.astype(bf),
                       preferred_element_type=jnp.float32) + bo

    np.testing.assert_allclose(np.asarray(out), np.asarray(ref(x)),
                               rtol=2e-2, atol=2e-2)
    print("KERNEL_OK")
</pallas_src>

<mosaic_0001>
module attributes {stable_mosaic.version = 11 : i64} {
  func.func @mlp_disc_kernel(%arg0: i32, %arg1: memref<16x1024xf32, #tpu.memory_space<vmem>>, %arg2: memref<1024x128xbf16, #tpu.memory_space<vmem>>, %arg3: memref<1x128xf32, #tpu.memory_space<vmem>>, %arg4: memref<128x128xbf16, #tpu.memory_space<vmem>>, %arg5: memref<1x128xf32, #tpu.memory_space<vmem>>, %arg6: memref<128x128xbf16, #tpu.memory_space<vmem>>, %arg7: memref<1x128xf32, #tpu.memory_space<vmem>>, %arg8: memref<128x128xbf16, #tpu.memory_space<vmem>>, %arg9: memref<1x128xf32, #tpu.memory_space<vmem>>, %arg10: memref<128x128xbf16, #tpu.memory_space<vmem>>, %arg11: memref<1x128xf32, #tpu.memory_space<vmem>>, %arg12: memref<16x128xf32, #tpu.memory_space<vmem>>) attributes {dimension_semantics = [#tpu.dimension_semantics<parallel>], iteration_bounds = array<i64: 1>, scalar_prefetch = 0 : i64, scratch_operands = 0 : i64, tpu.core_type = #tpu.core_type<tc>, window_params = [{transform_indices = @transform_0, window_bounds = array<i64: 16, 1024>}, {pipeline_mode = #tpu.pipeline_mode<synchronous>, transform_indices = @transform_1, window_bounds = array<i64: 1024, 128>}, {pipeline_mode = #tpu.pipeline_mode<synchronous>, transform_indices = @transform_2, window_bounds = array<i64: 1, 128>}, {pipeline_mode = #tpu.pipeline_mode<synchronous>, transform_indices = @transform_3, window_bounds = array<i64: 128, 128>}, {pipeline_mode = #tpu.pipeline_mode<synchronous>, transform_indices = @transform_4, window_bounds = array<i64: 1, 128>}, {pipeline_mode = #tpu.pipeline_mode<synchronous>, transform_indices = @transform_5, window_bounds = array<i64: 128, 128>}, {pipeline_mode = #tpu.pipeline_mode<synchronous>, transform_indices = @transform_6, window_bounds = array<i64: 1, 128>}, {pipeline_mode = #tpu.pipeline_mode<synchronous>, transform_indices = @transform_7, window_bounds = array<i64: 128, 128>}, {pipeline_mode = #tpu.pipeline_mode<synchronous>, transform_indices = @transform_8, window_bounds = array<i64: 1, 128>}, {pipeline_mode = #tpu.pipeline_mode<synchronous>, transform_indices = @transform_9, window_bounds = array<i64: 128, 128>}, {pipeline_mode = #tpu.pipeline_mode<synchronous>, transform_indices = @transform_10, window_bounds = array<i64: 1, 128>}, {transform_indices = @transform_11, window_bounds = array<i64: 16, 128>}]} {
    %c0 = arith.constant 0 : index
    %c0_0 = arith.constant 0 : index
    %0 = vector.load %arg1[%c0, %c0_0] : memref<16x1024xf32, #tpu.memory_space<vmem>>, vector<16x1024xf32>
    %1 = arith.truncf %0 : vector<16x1024xf32> to vector<16x1024xbf16>
    %c0_1 = arith.constant 0 : index
    %c0_2 = arith.constant 0 : index
    %2 = vector.load %arg2[%c0_1, %c0_2] : memref<1024x128xbf16, #tpu.memory_space<vmem>>, vector<1024x128xbf16>
    %cst = arith.constant dense<0.000000e+00> : vector<16x128xf32>
    %3 = tpu.matmul %1, %2, %cst {dimension_numbers = #tpu.dot_dimension_numbers<[1], [0], [0], [1], [0, 0, 1, 1], [], []>} : vector<16x1024xbf16>, vector<1024x128xbf16>, vector<16x128xf32> -> vector<16x128xf32>
    %c0_3 = arith.constant 0 : index
    %c0_4 = arith.constant 0 : index
    %4 = vector.load %arg3[%c0_3, %c0_4] : memref<1x128xf32, #tpu.memory_space<vmem>>, vector<1x128xf32>
    %5 = vector.broadcast %4 : vector<1x128xf32> to vector<16x128xf32>
    %6 = arith.addf %3, %5 : vector<16x128xf32>
    %7 = arith.truncf %6 : vector<16x128xf32> to vector<16x128xbf16>
    %c0_5 = arith.constant 0 : index
    %c0_6 = arith.constant 0 : index
    %8 = vector.load %arg4[%c0_5, %c0_6] : memref<128x128xbf16, #tpu.memory_space<vmem>>, vector<128x128xbf16>
    %cst_7 = arith.constant dense<0.000000e+00> : vector<16x128xf32>
    %9 = tpu.matmul %7, %8, %cst_7 {dimension_numbers = #tpu.dot_dimension_numbers<[1], [0], [0], [1], [0, 0, 1, 1], [], []>} : vector<16x128xbf16>, vector<128x128xbf16>, vector<16x128xf32> -> vector<16x128xf32>
    %c0_8 = arith.constant 0 : index
    %c0_9 = arith.constant 0 : index
    %10 = vector.load %arg5[%c0_8, %c0_9] : memref<1x128xf32, #tpu.memory_space<vmem>>, vector<1x128xf32>
    %11 = vector.broadcast %10 : vector<1x128xf32> to vector<16x128xf32>
    %12 = arith.addf %9, %11 : vector<16x128xf32>
    %cst_10 = arith.constant 0.000000e+00 : f32
    %13 = vector.broadcast %cst_10 : f32 to vector<16x128xf32>
    %14 = arith.cmpf oge, %12, %13 : vector<16x128xf32>
    %cst_11 = arith.constant 2.000000e-01 : f32
    %15 = vector.broadcast %cst_11 : f32 to vector<16x128xf32>
    %16 = arith.mulf %15, %12 : vector<16x128xf32>
    %17 = arith.select %14, %12, %16 : vector<16x128xi1>, vector<16x128xf32>
    %18 = arith.addf %17, %6 : vector<16x128xf32>
    %19 = arith.truncf %18 : vector<16x128xf32> to vector<16x128xbf16>
    %c0_12 = arith.constant 0 : index
    %c0_13 = arith.constant 0 : index
    %20 = vector.load %arg6[%c0_12, %c0_13] : memref<128x128xbf16, #tpu.memory_space<vmem>>, vector<128x128xbf16>
    %cst_14 = arith.constant dense<0.000000e+00> : vector<16x128xf32>
    %21 = tpu.matmul %19, %20, %cst_14 {dimension_numbers = #tpu.dot_dimension_numbers<[1], [0], [0], [1], [0, 0, 1, 1], [], []>} : vector<16x128xbf16>, vector<128x128xbf16>, vector<16x128xf32> -> vector<16x128xf32>
    %c0_15 = arith.constant 0 : index
    %c0_16 = arith.constant 0 : index
    %22 = vector.load %arg7[%c0_15, %c0_16] : memref<1x128xf32, #tpu.memory_space<vmem>>, vector<1x128xf32>
    %23 = vector.broadcast %22 : vector<1x128xf32> to vector<16x128xf32>
    %24 = arith.addf %21, %23 : vector<16x128xf32>
    %25 = arith.truncf %24 : vector<16x128xf32> to vector<16x128xbf16>
    %c0_17 = arith.constant 0 : index
    %c0_18 = arith.constant 0 : index
    %26 = vector.load %arg8[%c0_17, %c0_18] : memref<128x128xbf16, #tpu.memory_space<vmem>>, vector<128x128xbf16>
    %cst_19 = arith.constant dense<0.000000e+00> : vector<16x128xf32>
    %27 = tpu.matmul %25, %26, %cst_19 {dimension_numbers = #tpu.dot_dimension_numbers<[1], [0], [0], [1], [0, 0, 1, 1], [], []>} : vector<16x128xbf16>, vector<128x128xbf16>, vector<16x128xf32> -> vector<16x128xf32>
    %c0_20 = arith.constant 0 : index
    %c0_21 = arith.constant 0 : index
    %28 = vector.load %arg9[%c0_20, %c0_21] : memref<1x128xf32, #tpu.memory_space<vmem>>, vector<1x128xf32>
    %29 = vector.broadcast %28 : vector<1x128xf32> to vector<16x128xf32>
    %30 = arith.addf %27, %29 : vector<16x128xf32>
    %cst_22 = arith.constant 0.000000e+00 : f32
    %31 = vector.broadcast %cst_22 : f32 to vector<16x128xf32>
    %32 = arith.cmpf oge, %30, %31 : vector<16x128xf32>
    %cst_23 = arith.constant 2.000000e-01 : f32
    %33 = vector.broadcast %cst_23 : f32 to vector<16x128xf32>
    %34 = arith.mulf %33, %30 : vector<16x128xf32>
    %35 = arith.select %32, %30, %34 : vector<16x128xi1>, vector<16x128xf32>
    %36 = arith.addf %35, %24 : vector<16x128xf32>
    %37 = arith.truncf %36 : vector<16x128xf32> to vector<16x128xbf16>
    %c0_24 = arith.constant 0 : index
    %c0_25 = arith.constant 0 : index
    %38 = vector.load %arg10[%c0_24, %c0_25] : memref<128x128xbf16, #tpu.memory_space<vmem>>, vector<128x128xbf16>
    %cst_26 = arith.constant dense<0.000000e+00> : vector<16x128xf32>
    %39 = tpu.matmul %37, %38, %cst_26 {dimension_numbers = #tpu.dot_dimension_numbers<[1], [0], [0], [1], [0, 0, 1, 1], [], []>} : vector<16x128xbf16>, vector<128x128xbf16>, vector<16x128xf32> -> vector<16x128xf32>
    %c0_27 = arith.constant 0 : index
    %c0_28 = arith.constant 0 : index
    %40 = vector.load %arg11[%c0_27, %c0_28] : memref<1x128xf32, #tpu.memory_space<vmem>>, vector<1x128xf32>
    %41 = vector.broadcast %40 : vector<1x128xf32> to vector<16x128xf32>
    %42 = arith.addf %39, %41 : vector<16x128xf32>
    %c0_29 = arith.constant 0 : index
    %c0_30 = arith.constant 0 : index
    %43 = vector.load %arg12[%c0_29, %c0_30] : memref<16x128xf32, #tpu.memory_space<vmem>>, vector<16x128xf32>
    tpu.vector_store %arg12[%c0_29, %c0_30], %42 {strides = array<i32>} : memref<16x128xf32, #tpu.memory_space<vmem>>, vector<16x128xf32>,
    return
  }
  func.func @transform_0(%arg0: i32) -> (i32, i32) {
    %c0_i32 = arith.constant 0 : i32
    %c0_i32_0 = arith.constant 0 : i32
    return %arg0, %c0_i32 : i32, i32
  }
  func.func @transform_1(%arg0: i32) -> (i32, i32) {
    %c0_i32 = arith.constant 0 : i32
    %c0_i32_0 = arith.constant 0 : i32
    %c0_i32_1 = arith.constant 0 : i32
    return %c0_i32, %c0_i32_0 : i32, i32
  }
  func.func @transform_2(%arg0: i32) -> (i32, i32) {
    %c0_i32 = arith.constant 0 : i32
    %c0_i32_0 = arith.constant 0 : i32
    %c0_i32_1 = arith.constant 0 : i32
    return %c0_i32, %c0_i32_0 : i32, i32
  }
  func.func @transform_3(%arg0: i32) -> (i32, i32) {
    %c0_i32 = arith.constant 0 : i32
    %c0_i32_0 = arith.constant 0 : i32
    %c0_i32_1 = arith.constant 0 : i32
    return %c0_i32, %c0_i32_0 : i32, i32
  }
  func.func @transform_4(%arg0: i32) -> (i32, i32) {
    %c0_i32 = arith.constant 0 : i32
    %c0_i32_0 = arith.constant 0 : i32
    %c0_i32_1 = arith.constant 0 : i32
    return %c0_i32, %c0_i32_0 : i32, i32
  }
  func.func @transform_5(%arg0: i32) -> (i32, i32) {
    %c0_i32 = arith.constant 0 : i32
    %c0_i32_0 = arith.constant 0 : i32
    %c0_i32_1 = arith.constant 0 : i32
    return %c0_i32, %c0_i32_0 : i32, i32
  }
  func.func @transform_6(%arg0: i32) -> (i32, i32) {
    %c0_i32 = arith.constant 0 : i32
    %c0_i32_0 = arith.constant 0 : i32
    %c0_i32_1 = arith.constant 0 : i32
    return %c0_i32, %c0_i32_0 : i32, i32
  }
  func.func @transform_7(%arg0: i32) -> (i32, i32) {
    %c0_i32 = arith.constant 0 : i32
    %c0_i32_0 = arith.constant 0 : i32
    %c0_i32_1 = arith.constant 0 : i32
    return %c0_i32, %c0_i32_0 : i32, i32
  }
  func.func @transform_8(%arg0: i32) -> (i32, i32) {
    %c0_i32 = arith.constant 0 : i32
    %c0_i32_0 = arith.constant 0 : i32
    %c0_i32_1 = arith.constant 0 : i32
    return %c0_i32, %c0_i32_0 : i32, i32
  }
  func.func @transform_9(%arg0: i32) -> (i32, i32) {
    %c0_i32 = arith.constant 0 : i32
    %c0_i32_0 = arith.constant 0 : i32
    %c0_i32_1 = arith.constant 0 : i32
    return %c0_i32, %c0_i32_0 : i32, i32
  }
  func.func @transform_10(%arg0: i32) -> (i32, i32) {
    %c0_i32 = arith.constant 0 : i32
    %c0_i32_0 = arith.constant 0 : i32
    %c0_i32_1 = arith.constant 0 : i32
    return %c0_i32, %c0_i32_0 : i32, i32
  }
  func.func @transform_11(%arg0: i32) -> (i32, i32) {
    %c0_i32 = arith.constant 0 : i32
    %c0_i32_0 = arith.constant 0 : i32
    return %arg0, %c0_i32 : i32, i32
  }
}

module attributes {stable_mosaic.version = 11 : i64} {
  func.func @mlp_disc_kernel(%arg0: i32, %arg1: memref<16x1024xf32, #tpu.memory_space<vmem>>, %arg2: memref<1024x128xbf16, #tpu.memory_space<vmem>>, %arg3: memref<1x128xf32, #tpu.memory_space<vmem>>, %arg4: memref<128x128xbf16, #tpu.memory_space<vmem>>, %arg5: memref<1x128xf32, #tpu.memory_space<vmem>>, %arg6: memref<128x128xbf16, #tpu.memory_space<vmem>>, %arg7: memref<1x128xf32, #tpu.memory_space<vmem>>, %arg8: memref<128x128xbf16, #tpu.memory_space<vmem>>, %arg9: memref<1x128xf32, #tpu.memory_space<vmem>>, %arg10: memref<128x128xbf16, #tpu.memory_space<vmem>>, %arg11: memref<1x128xf32, #tpu.memory_space<vmem>>, %arg12: memref<16x128xf32, #tpu.memory_space<vmem>>) attributes {dimension_semantics = [#tpu.dimension_semantics<parallel>], iteration_bounds = array<i64: 1>, scalar_prefetch = 0 : i64, scratch_operands = 0 : i64, tpu.core_type = #tpu.core_type<tc>, window_params = [{transform_indices = @transform_0, window_bounds = array<i64: 16, 1024>}, {pipeline_mode = #tpu.pipeline_mode<synchronous>, transform_indices = @transform_1, window_bounds = array<i64: 1024, 128>}, {pipeline_mode = #tpu.pipeline_mode<synchronous>, transform_indices = @transform_2, window_bounds = array<i64: 1, 128>}, {pipeline_mode = #tpu.pipeline_mode<synchronous>, transform_indices = @transform_3, window_bounds = array<i64: 128, 128>}, {pipeline_mode = #tpu.pipeline_mode<synchronous>, transform_indices = @transform_4, window_bounds = array<i64: 1, 128>}, {pipeline_mode = #tpu.pipeline_mode<synchronous>, transform_indices = @transform_5, window_bounds = array<i64: 128, 128>}, {pipeline_mode = #tpu.pipeline_mode<synchronous>, transform_indices = @transform_6, window_bounds = array<i64: 1, 128>}, {pipeline_mode = #tpu.pipeline_mode<synchronous>, transform_indices = @transform_7, window_bounds = array<i64: 128, 128>}, {pipeline_mode = #tpu.pipeline_mode<synchronous>, transform_indices = @transform_8, window_bounds = array<i64: 1, 128>}, {pipeline_mode = #tpu.pipeline_mode<synchronous>, transform_indices = @transform_9, window_bounds = array<i64: 128, 128>}, {pipeline_mode = #tpu.pipeline_mode<synchronous>, transform_indices = @transform_10, window_bounds = array<i64: 1, 128>}, {transform_indices = @transform_11, window_bounds = array<i64: 16, 128>}]} {
    %c0 = arith.constant 0 : index
    %c0_0 = arith.constant 0 : index
    %0 = vector.load %arg1[%c0, %c0_0] : memref<16x1024xf32, #tpu.memory_space<vmem>>, vector<16x1024xf32>
    %1 = arith.truncf %0 : vector<16x1024xf32> to vector<16x1024xbf16>
    %c0_1 = arith.constant 0 : index
    %c0_2 = arith.constant 0 : index
    %2 = vector.load %arg2[%c0_1, %c0_2] : memref<1024x128xbf16, #tpu.memory_space<vmem>>, vector<1024x128xbf16>
    %cst = arith.constant dense<0.000000e+00> : vector<16x128xf32>
    %3 = tpu.matmul %1, %2, %cst {dimension_numbers = #tpu.dot_dimension_numbers<[1], [0], [0], [1], [0, 0, 1, 1], [], []>} : vector<16x1024xbf16>, vector<1024x128xbf16>, vector<16x128xf32> -> vector<16x128xf32>
    %c0_3 = arith.constant 0 : index
    %c0_4 = arith.constant 0 : index
    %4 = vector.load %arg3[%c0_3, %c0_4] : memref<1x128xf32, #tpu.memory_space<vmem>>, vector<1x128xf32>
    %5 = vector.broadcast %4 : vector<1x128xf32> to vector<16x128xf32>
    %6 = arith.addf %3, %5 : vector<16x128xf32>
    %7 = arith.truncf %6 : vector<16x128xf32> to vector<16x128xbf16>
    %c0_5 = arith.constant 0 : index
    %c0_6 = arith.constant 0 : index
    %8 = vector.load %arg4[%c0_5, %c0_6] : memref<128x128xbf16, #tpu.memory_space<vmem>>, vector<128x128xbf16>
    %cst_7 = arith.constant dense<0.000000e+00> : vector<16x128xf32>
    %9 = tpu.matmul %7, %8, %cst_7 {dimension_numbers = #tpu.dot_dimension_numbers<[1], [0], [0], [1], [0, 0, 1, 1], [], []>} : vector<16x128xbf16>, vector<128x128xbf16>, vector<16x128xf32> -> vector<16x128xf32>
    %c0_8 = arith.constant 0 : index
    %c0_9 = arith.constant 0 : index
    %10 = vector.load %arg5[%c0_8, %c0_9] : memref<1x128xf32, #tpu.memory_space<vmem>>, vector<1x128xf32>
    %11 = vector.broadcast %10 : vector<1x128xf32> to vector<16x128xf32>
    %12 = arith.addf %9, %11 : vector<16x128xf32>
    %cst_10 = arith.constant 0.000000e+00 : f32
    %13 = vector.broadcast %cst_10 : f32 to vector<16x128xf32>
    %14 = arith.cmpf oge, %12, %13 : vector<16x128xf32>
    %cst_11 = arith.constant 2.000000e-01 : f32
    %15 = vector.broadcast %cst_11 : f32 to vector<16x128xf32>
    %16 = arith.mulf %15, %12 : vector<16x128xf32>
    %17 = arith.select %14, %12, %16 : vector<16x128xi1>, vector<16x128xf32>
    %18 = arith.addf %17, %6 : vector<16x128xf32>
    %19 = arith.truncf %18 : vector<16x128xf32> to vector<16x128xbf16>
    %c0_12 = arith.constant 0 : index
    %c0_13 = arith.constant 0 : index
    %20 = vector.load %arg6[%c0_12, %c0_13] : memref<128x128xbf16, #tpu.memory_space<vmem>>, vector<128x128xbf16>
    %cst_14 = arith.constant dense<0.000000e+00> : vector<16x128xf32>
    %21 = tpu.matmul %19, %20, %cst_14 {dimension_numbers = #tpu.dot_dimension_numbers<[1], [0], [0], [1], [0, 0, 1, 1], [], []>} : vector<16x128xbf16>, vector<128x128xbf16>, vector<16x128xf32> -> vector<16x128xf32>
    %c0_15 = arith.constant 0 : index
    %c0_16 = arith.constant 0 : index
    %22 = vector.load %arg7[%c0_15, %c0_16] : memref<1x128xf32, #tpu.memory_space<vmem>>, vector<1x128xf32>
    %23 = vector.broadcast %22 : vector<1x128xf32> to vector<16x128xf32>
    %24 = arith.addf %21, %23 : vector<16x128xf32>
    %25 = arith.truncf %24 : vector<16x128xf32> to vector<16x128xbf16>
    %c0_17 = arith.constant 0 : index
    %c0_18 = arith.constant 0 : index
    %26 = vector.load %arg8[%c0_17, %c0_18] : memref<128x128xbf16, #tpu.memory_space<vmem>>, vector<128x128xbf16>
    %cst_19 = arith.constant dense<0.000000e+00> : vector<16x128xf32>
    %27 = tpu.matmul %25, %26, %cst_19 {dimension_numbers = #tpu.dot_dimension_numbers<[1], [0], [0], [1], [0, 0, 1, 1], [], []>} : vector<16x128xbf16>, vector<128x128xbf16>, vector<16x128xf32> -> vector<16x128xf32>
    %c0_20 = arith.constant 0 : index
    %c0_21 = arith.constant 0 : index
    %28 = vector.load %arg9[%c0_20, %c0_21] : memref<1x128xf32, #tpu.memory_space<vmem>>, vector<1x128xf32>
    %29 = vector.broadcast %28 : vector<1x128xf32> to vector<16x128xf32>
    %30 = arith.addf %27, %29 : vector<16x128xf32>
    %cst_22 = arith.constant 0.000000e+00 : f32
    %31 = vector.broadcast %cst_22 : f32 to vector<16x128xf32>
    %32 = arith.cmpf oge, %30, %31 : vector<16x128xf32>
    %cst_23 = arith.constant 2.000000e-01 : f32
    %33 = vector.broadcast %cst_23 : f32 to vector<16x128xf32>
    %34 = arith.mulf %33, %30 : vector<16x128xf32>
    %35 = arith.select %32, %30, %34 : vector<16x128xi1>, vector<16x128xf32>
    %36 = arith.addf %35, %24 : vector<16x128xf32>
    %37 = arith.truncf %36 : vector<16x128xf32> to vector<16x128xbf16>
    %c0_24 = arith.constant 0 : index
    %c0_25 = arith.constant 0 : index
    %38 = vector.load %arg10[%c0_24, %c0_25] : memref<128x128xbf16, #tpu.memory_space<vmem>>, vector<128x128xbf16>
    %cst_26 = arith.constant dense<0.000000e+00> : vector<16x128xf32>
    %39 = tpu.matmul %37, %38, %cst_26 {dimension_numbers = #tpu.dot_dimension_numbers<[1], [0], [0], [1], [0, 0, 1, 1], [], []>} : vector<16x128xbf16>, vector<128x128xbf16>, vector<16x128xf32> -> vector<16x128xf32>
    %c0_27 = arith.constant 0 : index
    %c0_28 = arith.constant 0 : index
    %40 = vector.load %arg11[%c0_27, %c0_28] : memref<1x128xf32, #tpu.memory_space<vmem>>, vector<1x128xf32>
    %41 = vector.broadcast %40 : vector<1x128xf32> to vector<16x128xf32>
    %42 = arith.addf %39, %41 : vector<16x128xf32>
    %c0_29 = arith.constant 0 : index
    %c0_30 = arith.constant 0 : index
    %43 = vector.load %arg12[%c0_29, %c0_30] : memref<16x128xf32, #tpu.memory_space<vmem>>, vector<16x128xf32>
    tpu.vector_store %arg12[%c0_29, %c0_30], %42 {strides = array<i32>} : memref<16x128xf32, #tpu.memory_space<vmem>>, vector<16x128xf32>,
    return
  }
  func.func @transform_0(%arg0: i32) -> (i32, i32) {
    %c0_i32 = arith.constant 0 : i32
    %c0_i32_0 = arith.constant 0 : i32
    return %arg0, %c0_i32 : i32, i32
  }
  func.func @transform_1(%arg0: i32) -> (i32, i32) {
    %c0_i32 = arith.constant 0 : i32
    %c0_i32_0 = arith.constant 0 : i32
    %c0_i32_1 = arith.constant 0 : i32
    return %c0_i32, %c0_i32_0 : i32, i32
  }
  func.func @transform_2(%arg0: i32) -> (i32, i32) {
    %c0_i32 = arith.constant 0 : i32
    %c0_i32_0 = arith.constant 0 : i32
    %c0_i32_1 = arith.constant 0 : i32
    return %c0_i32, %c0_i32_0 : i32, i32
  }
  func.func @transform_3(%arg0: i32) -> (i32, i32) {
    %c0_i32 = arith.constant 0 : i32
    %c0_i32_0 = arith.constant 0 : i32
    %c0_i32_1 = arith.constant 0 : i32
    return %c0_i32, %c0_i32_0 : i32, i32
  }
  func.func @transform_4(%arg0: i32) -> (i32, i32) {
    %c0_i32 = arith.constant 0 : i32
    %c0_i32_0 = arith.constant 0 : i32
    %c0_i32_1 = arith.constant 0 : i32
    return %c0_i32, %c0_i32_0 : i32, i32
  }
  func.func @transform_5(%arg0: i32) -> (i32, i32) {
    %c0_i32 = arith.constant 0 : i32
    %c0_i32_0 = arith.constant 0 : i32
    %c0_i32_1 = arith.constant 0 : i32
    return %c0_i32, %c0_i32_0 : i32, i32
  }
  func.func @transform_6(%arg0: i32) -> (i32, i32) {
    %c0_i32 = arith.constant 0 : i32
    %c0_i32_0 = arith.constant 0 : i32
    %c0_i32_1 = arith.constant 0 : i32
    return %c0_i32, %c0_i32_0 : i32, i32
  }
  func.func @transform_7(%arg0: i32) -> (i32, i32) {
    %c0_i32 = arith.constant 0 : i32
    %c0_i32_0 = arith.constant 0 : i32
    %c0_i32_1 = arith.constant 0 : i32
    return %c0_i32, %c0_i32_0 : i32, i32
  }
  func.func @transform_8(%arg0: i32) -> (i32, i32) {
    %c0_i32 = arith.constant 0 : i32
    %c0_i32_0 = arith.constant 0 : i32
    %c0_i32_1 = arith.constant 0 : i32
    return %c0_i32, %c0_i32_0 : i32, i32
  }
  func.func @transform_9(%arg0: i32) -> (i32, i32) {
    %c0_i32 = arith.constant 0 : i32
    %c0_i32_0 = arith.constant 0 : i32
    %c0_i32_1 = arith.constant 0 : i32
    return %c0_i32, %c0_i32_0 : i32, i32
  }
  func.func @transform_10(%arg0: i32) -> (i32, i32) {
    %c0_i32 = arith.constant 0 : i32
    %c0_i32_0 = arith.constant 0 : i32
    %c0_i32_1 = arith.constant 0 : i32
    return %c0_i32, %c0_i32_0 : i32, i32
  }
  func.func @transform_11(%arg0: i32) -> (i32, i32) {
    %c0_i32 = arith.constant 0 : i32
    %c0_i32_0 = arith.constant 0 : i32
    return %arg0, %c0_i32 : i32, i32
  }
}

</mosaic_0001>

<bundles_post_ra>
// kernel: tpu_custom_call.1
= control target key start
LH: loop header
LB: loop body
LE: loop exit
PB: predicated region body
PF: predicated region fallthrough
CT: control target
= control target key end

     0   :  { %16 = vsyncpa [#allocation3], 0  ;;  %s1956_s0 = inlined_call_operand.hbm [shape: f32[16,1024], index: 0, kind: input, shape index: {}]   ;;  %s1957_s1 = inlined_call_operand.hbm [shape: bf16[1024,128], index: 1, kind: input, shape index: {}]   ;;  %s1958_s2 = inlined_call_operand.vmem [shape: f32[1,128], index: 2, kind: input, shape index: {}]   ;;  %s1959_s3 = inlined_call_operand.hbm [shape: bf16[128,128], index: 3, kind: input, shape index: {}]   ;;  %s1960_s4 = inlined_call_operand.vmem [shape: f32[1,128], index: 4, kind: input, shape index: {}]   ;;  %s1961_s5 = inlined_call_operand.hbm [shape: bf16[128,128], index: 5, kind: input, shape index: {}]   ;;  %s1962_s6 = inlined_call_operand.vmem [shape: f32[1,128], index: 6, kind: input, shape index: {}]   ;;  %s1963_s7 = inlined_call_operand.hbm [shape: bf16[128,128], index: 7, kind: input, shape index: {}]   ;;  %s1964_s8 = inlined_call_operand.vmem [shape: f32[1,128], index: 8, kind: input, shape index: {}]   ;;  %s1965_s9 = inlined_call_operand.hbm [shape: bf16[128,128], index: 9, kind: input, shape index: {}]   ;;  %s1966_s10 = inlined_call_operand.vmem [shape: f32[1,128], index: 10, kind: input, shape index: {}]   ;;  %s1967_s11 = inlined_call_operand.hbm [shape: f32[16,128], index: 11, kind: output, shape index: {}]  }
   0x1   :  { %17 = vsyncpa [#allocation6], 0 }
   0x2   :  { %18 = vsyncpa [#allocation9], 0 }
   0x3   :  { %19 = vsyncpa [#allocation12], 0  ;;  %s38_s19 = sshll.u32 %s1957_s1, 4  ;;  %s39_s19 = int_to_ptr.hbm [resolvable:$true] %s38_s19 }
   0x4   :  { %20 = vsyncpa [#allocation4], 0  ;;  %s1832_s20 = smov [#allocation5]   ;;  %s68_s24 = sshll.u32 %s1961_s5, 4  ;;  %s69_s24 = int_to_ptr.hbm [resolvable:$true] %s68_s24 }
   0x5   :  { %s40_s21 = sshll.u32 %s1832_s20, 4  ;;  %s1833_s25 = smov 64   ;;  %s41_s21 = int_to_ptr.vmem [resolvable:$true] %s40_s21 }
   0x6   :  { %s1834_s26 = smov 4   ;;  %s1835_s27 = smov [#allocation8]  }
   0x7   :  { %46 = dma.hbm_to_vmem [thread:$0]  %s39_s19, 8192, %s41_s21, [#allocation6], %s1833_s25, %s1833_s25, %s1834_s26  }
   0x8   :  { %s70_s28 = sshll.u32 %s1835_s27, 4  ;;  %s25_s30 = sshll.u32 %s1956_s0, 4  ;;  %s71_s28 = int_to_ptr.vmem [resolvable:$true] %s70_s28  ;;  %s26_s30 = int_to_ptr.hbm [resolvable:$true] %s25_s30 }
   0x9   :  { %76 = dma.hbm_to_vmem [thread:$0]  %s69_s24, 1024, %s71_s28, [#allocation9], %s1833_s25, %s1833_s25, %s1834_s26  }
   0xa   :  { %s1836_s5 = smov [#allocation2]   ;;  %s53_s15 = sshll.u32 %s1959_s3, 4  ;;  %s54_s15 = int_to_ptr.hbm [resolvable:$true] %s53_s15 }
   0xb   :  { %s27_s12 = sshll.u32 %s1836_s5, 4  ;;  %s1837_s16 = smov 1024   ;;  %s28_s12 = int_to_ptr.vmem [resolvable:$true] %s27_s12 }
   0xc   :  { %33 = dma.hbm_to_vmem [thread:$0]  %s26_s30, 2048, %s28_s12, [#allocation3], %s1837_s16, %s1837_s16, %s1833_s25  }
   0xd   :  { %s83_s0 = sshll.u32 %s1963_s7, 4  ;;  %s1838_s19 = smov [#allocation7]   ;;  %s84_s0 = int_to_ptr.hbm [resolvable:$true] %s83_s0 }
   0xe   :  { %s55_s20 = sshll.u32 %s1838_s19, 4  ;;  %s1839_s21 = smov [#allocation10]   ;;  %s56_s20 = int_to_ptr.vmem [resolvable:$true] %s55_s20 }
   0xf   :  { %61 = dma.hbm_to_vmem [thread:$0]  %s54_s15, 1024, %s56_s20, [#allocation6], %s1833_s25, %s1833_s25, %s1834_s26  }
  0x10   :  { %s85_s22 = sshll.u32 %s1839_s21, 4  ;;  %s98_s24 = sshll.u32 %s1965_s9, 4  ;;  %s86_s22 = int_to_ptr.vmem [resolvable:$true] %s85_s22  ;;  %s99_s24 = int_to_ptr.hbm [resolvable:$true] %s98_s24 }
  0x11   :  { %91 = dma.hbm_to_vmem [thread:$0]  %s84_s0, 1024, %s86_s22, [#allocation9], %s1833_s25, %s1833_s25, %s1834_s26  }
  0x12   :  { %s1840_s7 = smov [#allocation11]  }
  0x13   :  { %s100_s27 = sshll.u32 %s1840_s7, 4  ;;  %s101_s27 = int_to_ptr.vmem [resolvable:$true] %s100_s27 }
  0x14   :  { %106 = dma.hbm_to_vmem [thread:$0]  %s99_s24, 1024, %s101_s27, [#allocation12], %s1833_s25, %s1833_s25, %s1834_s26  }
  0x15   :  { %1822 = dma.done.wait [#allocation3], 2048  }
  0x16   :  { %1823 = vsyncadd [#allocation3], 4294965248 }
  0x17   :  { %1824 = dma.done.wait [#allocation6], 9216  }
  0x18   :  { %1825 = vsyncadd [#allocation6], 4294958080 }
  0x19   :  { %1826 = dma.done.wait [#allocation9], 2048  }
  0x1a   :  { %1827 = vsyncadd [#allocation9], 4294965248 }
  0x1b   :  { %1828 = dma.done.wait [#allocation12], 1024  }
  0x1c   :  { %1829 = vsyncadd [#allocation12], 4294966272  ;;  %v1548_v0 = vld [vmem:[#allocation5 + $0x38] sm:$0xff]  ;;  %v1547_v4 = vld [vmem:[#allocation5 + $0x30] sm:$0xff]  ;;  %s1141_s14 = sshll.u32 %s1967_s11, 4  ;;  %s1842_s15 = smov 128   ;;  %s1142_s14 = int_to_ptr.hbm [resolvable:$true] %s1141_s14 }
  0x1d   :  { %v1556_v1 = vld [vmem:[#allocation5 + $0x78] sm:$0xff]  ;;  %673 = vmatpush.bf16.msra.mxu0 %v1548_v0  ;;  %v1555_v5 = vld [vmem:[#allocation5 + $0x70] sm:$0xff]  ;;  %v1546_v8 = vld [vmem:[#allocation5 + $0x28] sm:$0xff]  ;;  %s1843_s16 = smov 8  }
  0x1e   :  { %v1564_v2 = vld [vmem:[#allocation5 + $0xb8] sm:$0xff]  ;;  %687 = vmatpush.bf16.msra.mxu1 %v1556_v1  ;;  %v1563_v6 = vld [vmem:[#allocation5 + $0xb0] sm:$0xff]  ;;  %v1554_v9 = vld [vmem:[#allocation5 + $0x68] sm:$0xff] }
  0x1f   :  { %v1572_v3 = vld [vmem:[#allocation5 + $0xf8] sm:$0xff]  ;;  %701 = vmatpush.bf16.msra.mxu2 %v1564_v2  ;;  %v1571_v7 = vld [vmem:[#allocation5 + $0xf0] sm:$0xff]  ;;  %v1562_v10 = vld [vmem:[#allocation5 + $0xa8] sm:$0xff] }
  0x20   :  { %715 = vmatpush.bf16.msra.mxu3 %v1572_v3  ;;  %v1570_v11 = vld [vmem:[#allocation5 + $0xe8] sm:$0xff]  ;;  %v1545_v12 = vld [vmem:[#allocation5 + $0x20] sm:$0xff]  ;;  %v1544_v16 = vld [vmem:[#allocation5 + $0x18] sm:$0xff] }
  0x21   :  { %674 = vmatpush.bf16.msra.mxu0 %v1547_v4  ;;  %v1553_v13 = vld [vmem:[#allocation5 + $0x60] sm:$0xff]  ;;  %v1552_v17 = vld [vmem:[#allocation5 + $0x58] sm:$0xff]  ;;  %v1543_v20 = vld [vmem:[#allocation5 + $0x10] sm:$0xff] }
  0x22   :  { %688 = vmatpush.bf16.msra.mxu1 %v1555_v5  ;;  %v1561_v14 = vld [vmem:[#allocation5 + $0xa0] sm:$0xff]  ;;  %v1560_v18 = vld [vmem:[#allocation5 + $0x98] sm:$0xff]  ;;  %v1551_v21 = vld [vmem:[#allocation5 + $0x50] sm:$0xff] }
  0x23   :  { %702 = vmatpush.bf16.msra.mxu2 %v1563_v6  ;;  %v1569_v15 = vld [vmem:[#allocation5 + $0xe0] sm:$0xff]  ;;  %v1568_v19 = vld [vmem:[#allocation5 + $0xd8] sm:$0xff]  ;;  %v1559_v22 = vld [vmem:[#allocation5 + $0x90] sm:$0xff] }
  0x24   :  { %716 = vmatpush.bf16.msra.mxu3 %v1571_v7  ;;  %v1567_v23 = vld [vmem:[#allocation5 + $0xd0] sm:$0xff]  ;;  %v1542_v24 = vld [vmem:[#allocation5 + $0x8] sm:$0xff]  ;;  %v1541_v28 = vld [vmem:[#allocation5] sm:$0xff] }
  0x25   :  { %675 = vmatpush.bf16.msra.mxu0 %v1546_v8  ;;  %v1550_v25 = vld [vmem:[#allocation5 + $0x48] sm:$0xff]  ;;  %v1549_v29 = vld [vmem:[#allocation5 + $0x40] sm:$0xff]  ;;  %v1580_v32 = vld [vmem:[#allocation5 + $0x138] sm:$0xff] }
  0x26   :  { %689 = vmatpush.bf16.msra.mxu1 %v1554_v9  ;;  %v1558_v26 = vld [vmem:[#allocation5 + $0x88] sm:$0xff]  ;;  %v1557_v30 = vld [vmem:[#allocation5 + $0x80] sm:$0xff]  ;;  %v1588_v33 = vld [vmem:[#allocation5 + $0x178] sm:$0xff] }
  0x27   :  { %703 = vmatpush.bf16.msra.mxu2 %v1562_v10  ;;  %v1566_v27 = vld [vmem:[#allocation5 + $0xc8] sm:$0xff]  ;;  %v1565_v31 = vld [vmem:[#allocation5 + $0xc0] sm:$0xff]  ;;  %v135_v34 = vld [vmem:[#allocation2 + $0x10] sm:$0xff] }
  0x28   :  { %717 = vmatpush.bf16.msra.mxu3 %v1570_v11  ;;  %v143_v35 = vld [vmem:[#allocation2 + $0x50] sm:$0xff]  ;;  %v133_v36 = vld [vmem:[#allocation2] sm:$0xff]  ;;  %v136_v38 = vld [vmem:[#allocation2 + $0x18] sm:$0xff] }
  0x29   :  { %676 = vmatpush.bf16.msra.mxu0 %v1545_v12  ;;  %v141_v37 = vld [vmem:[#allocation2 + $0x40] sm:$0xff]  ;;  %v144_v39 = vld [vmem:[#allocation2 + $0x58] sm:$0xff]  ;;  %v134_v40 = vld [vmem:[#allocation2 + $0x8] sm:$0xff]  ;;  %v151_v44 = vpack.c.bf16 %v143_v35, %v135_v34 }
  0x2a   :  { %690 = vmatpush.bf16.msra.mxu1 %v1553_v13  ;;  %v142_v41 = vld [vmem:[#allocation2 + $0x48] sm:$0xff]  ;;  %v1596_v42 = vld [vmem:[#allocation5 + $0x1b8] sm:$0xff]  ;;  %v149_v45 = vpack.c.bf16 %v141_v37, %v133_v36  ;;  %v152_v46 = vpack.c.bf16 %v144_v39, %v136_v38  ;;  %v1579_v48 = vld [vmem:[#allocation5 + $0x130] sm:$0xff] }
  0x2b   :  { %704 = vmatpush.bf16.msra.mxu2 %v1561_v14  ;;  %v1604_v43 = vld [vmem:[#allocation5 + $0x1f8] sm:$0xff]  ;;  %v150_v47 = vpack.c.bf16 %v142_v41, %v134_v40  ;;  %v1587_v49 = vld [vmem:[#allocation5 + $0x170] sm:$0xff]  ;;  %v1578_v52 = vld [vmem:[#allocation5 + $0x128] sm:$0xff] }
  0x2c   :  { %718 = vmatpush.bf16.msra.mxu3 %v1569_v15  ;;  %v1595_v50 = vld [vmem:[#allocation5 + $0x1b0] sm:$0xff]  ;;  %v1586_v53 = vld [vmem:[#allocation5 + $0x168] sm:$0xff]  ;;  %v1577_v56 = vld [vmem:[#allocation5 + $0x120] sm:$0xff] }
  0x2d   :  { %677 = vmatpush.bf16.msra.mxu0 %v1544_v16  ;;  %v1603_v51 = vld [vmem:[#allocation5 + $0x1f0] sm:$0xff]  ;;  %v1594_v54 = vld [vmem:[#allocation5 + $0x1a8] sm:$0xff]  ;;  %v1585_v57 = vld [vmem:[#allocation5 + $0x160] sm:$0xff] }
  0x2e   :  { %691 = vmatpush.bf16.msra.mxu1 %v1552_v17  ;;  %v1602_v55 = vld [vmem:[#allocation5 + $0x1e8] sm:$0xff]  ;;  %v1593_v58 = vld [vmem:[#allocation5 + $0x1a0] sm:$0xff]  ;;  %v1576_v60 = vld [vmem:[#allocation5 + $0x118] sm:$0xff] }
  0x2f   :  { %705 = vmatpush.bf16.msra.mxu2 %v1560_v18  ;;  %v1601_v59 = vld [vmem:[#allocation5 + $0x1e0] sm:$0xff]  ;;  %v1584_v61 = vld [vmem:[#allocation5 + $0x158] sm:$0xff]  ;;  %v1575_v0 = vld [vmem:[#allocation5 + $0x110] sm:$0xff] }
  0x30   :  { %719 = vmatpush.bf16.msra.mxu3 %v1568_v19  ;;  %v1592_v62 = vld [vmem:[#allocation5 + $0x198] sm:$0xff]  ;;  %v1583_v1 = vld [vmem:[#allocation5 + $0x150] sm:$0xff]  ;;  %v1574_v4 = vld [vmem:[#allocation5 + $0x108] sm:$0xff] }
  0x31   :  { %678 = vmatpush.bf16.msra.mxu0 %v1543_v20  ;;  %v1600_v63 = vld [vmem:[#allocation5 + $0x1d8] sm:$0xff]  ;;  %v1591_v2 = vld [vmem:[#allocation5 + $0x190] sm:$0xff]  ;;  %v1582_v5 = vld [vmem:[#allocation5 + $0x148] sm:$0xff] }
  0x32   :  { %692 = vmatpush.bf16.msra.mxu1 %v1551_v21  ;;  %v1599_v3 = vld [vmem:[#allocation5 + $0x1d0] sm:$0xff]  ;;  %v1590_v6 = vld [vmem:[#allocation5 + $0x188] sm:$0xff]  ;;  %v1573_v8 = vld [vmem:[#allocation5 + $0x100] sm:$0xff] }
  0x33   :  { %706 = vmatpush.bf16.msra.mxu2 %v1559_v22  ;;  %v1598_v7 = vld [vmem:[#allocation5 + $0x1c8] sm:$0xff]  ;;  %v1581_v9 = vld [vmem:[#allocation5 + $0x140] sm:$0xff]  ;;  %v139_v16 = vld [vmem:[#allocation2 + $0x30] sm:$0xff] }
  0x34   :  { %720 = vmatpush.bf16.msra.mxu3 %v1567_v23  ;;  %v1589_v10 = vld [vmem:[#allocation5 + $0x180] sm:$0xff]  ;;  %v138_v14 = vld [vmem:[#allocation2 + $0x28] sm:$0xff]  ;;  %v147_v17 = vld [vmem:[#allocation2 + $0x70] sm:$0xff] }
  0x35   :  { %679 = vmatpush.bf16.msra.mxu0 %v1542_v24  ;;  %v1597_v11 = vld [vmem:[#allocation5 + $0x1c0] sm:$0xff]  ;;  %v146_v15 = vld [vmem:[#allocation2 + $0x68] sm:$0xff]  ;;  %v140_v18 = vld [vmem:[#allocation2 + $0x38] sm:$0xff]  ;;  %v155_v22 = vpack.c.bf16 %v147_v17, %v139_v16 }
  0x36   :  { %693 = vmatpush.bf16.msra.mxu1 %v1550_v25  ;;  %v137_v12 = vld [vmem:[#allocation2 + $0x20] sm:$0xff]  ;;  %v148_v19 = vld [vmem:[#allocation2 + $0x78] sm:$0xff]  ;;  %v154_v21 = vpack.c.bf16 %v146_v15, %v138_v14  ;;  %v1611_v25 = vld [vmem:[#allocation7 + $0x30] sm:$0xff] }
  0x37   :  { %707 = vmatpush.bf16.msra.mxu2 %v1558_v26  ;;  %v145_v13 = vld [vmem:[#allocation2 + $0x60] sm:$0xff]  ;;  %v156_v23 = vpack.c.bf16 %v148_v19, %v140_v18  ;;  %v1612_v24 = vld [vmem:[#allocation7 + $0x38] sm:$0xff]  ;;  %v1610_v26 = vld [vmem:[#allocation7 + $0x28] sm:$0xff] }
  0x38   :  { %721 = vmatpush.bf16.msra.mxu3 %v1566_v27  ;;  %v153_v20 = vpack.c.bf16 %v145_v13, %v137_v12  ;;  %v1609_v27 = vld [vmem:[#allocation7 + $0x20] sm:$0xff]  ;;  %v1620_v37 = vld [vmem:[#allocation8 + $0x38] sm:$0xff]  ;;  %v1619_v39 = vld [vmem:[#allocation8 + $0x30] sm:$0xff] }
  0x39   :  { %680 = vmatpush.bf16.msra.mxu0 %v1541_v28  ;;  %v1608_v28 = vld [vmem:[#allocation7 + $0x18] sm:$0xff]  ;;  %v1649_v36 = vld [vmem:[%s1958_s2] ss:$0 sm:$0xff]  ;;  %v1626_v12 = vld [vmem:[#allocation10 + $0x28] sm:$0xff] }
  0x3a   :  { %694 = vmatpush.bf16.msra.mxu1 %v1549_v29  ;;  %v1607_v29 = vld [vmem:[#allocation7 + $0x10] sm:$0xff]  ;;  %v1625_v13 = vld [vmem:[#allocation10 + $0x20] sm:$0xff]  ;;  %v1624_v16 = vld [vmem:[#allocation10 + $0x18] sm:$0xff] }
  0x3b   :  { %708 = vmatpush.bf16.msra.mxu2 %v1557_v30  ;;  %v1606_v30 = vld [vmem:[#allocation7 + $0x8] sm:$0xff]  ;;  %v1650_v14 = vld [vmem:[%s1960_s4] ss:$0 sm:$0xff] }
  0x3c   :  { %722 = vmatpush.bf16.msra.mxu3 %v1565_v31  ;;  %681 = vmatmul.bf16.vlgmr.msra.gmra.mxu0 %v149_v45 }
  0x3d   :  { %729 = vmatpush.bf16.msrb.mxu0 %v1580_v32  ;;  %695 = vmatmul.bf16.vlgmr.msra.gmra.mxu1 %v150_v47 }
  0x3e   :  { %743 = vmatpush.bf16.msrb.mxu1 %v1588_v33  ;;  %709 = vmatmul.bf16.vlgmr.msra.gmra.mxu2 %v151_v44  ;;  %v1605_v33 = vld [vmem:[#allocation7] sm:$0xff] }
  0x3f   :  { %757 = vmatpush.bf16.msrb.mxu2 %v1596_v42  ;;  %723 = vmatmul.bf16.vlgmr.msra.gmra.mxu3 %v152_v46 }
  0x40   :  { %771 = vmatpush.bf16.msrb.mxu3 %v1604_v43  ;;  %v1618_v43 = vld [vmem:[#allocation8 + $0x28] sm:$0xff] }
  0x41   :  { %730 = vmatpush.bf16.msrb.mxu0 %v1579_v48 }
  0x42   :  { %744 = vmatpush.bf16.msrb.mxu1 %v1587_v49  ;;  %v1617_v49 = vld [vmem:[#allocation8 + $0x20] sm:$0xff] }
  0x43   :  { %758 = vmatpush.bf16.msrb.mxu2 %v1595_v50 }
  0x44   :  { %772 = vmatpush.bf16.msrb.mxu3 %v1603_v51 }
  0x45   :  { %731 = vmatpush.bf16.msrb.mxu0 %v1578_v52 }
  0x46   :  { %745 = vmatpush.bf16.msrb.mxu1 %v1586_v53 }
  0x47   :  { %759 = vmatpush.bf16.msrb.mxu2 %v1594_v54 }
  0x48   :  { %773 = vmatpush.bf16.msrb.mxu3 %v1602_v55 }
  0x49   :  { %732 = vmatpush.bf16.msrb.mxu0 %v1577_v56 }
  0x4a   :  { %746 = vmatpush.bf16.msrb.mxu1 %v1585_v57 }
  0x4b   :  { %760 = vmatpush.bf16.msrb.mxu2 %v1593_v58 }
  0x4c   :  { %774 = vmatpush.bf16.msrb.mxu3 %v1601_v59 }
  0x4d   :  { %733 = vmatpush.bf16.msrb.mxu0 %v1576_v60 }
  0x4e   :  { %747 = vmatpush.bf16.msrb.mxu1 %v1584_v61 }
  0x4f   :  { %761 = vmatpush.bf16.msrb.mxu2 %v1592_v62 }
  0x50   :  { %775 = vmatpush.bf16.msrb.mxu3 %v1600_v63 }
  0x51   :  { %734 = vmatpush.bf16.msrb.mxu0 %v1575_v0 }
  0x52   :  { %748 = vmatpush.bf16.msrb.mxu1 %v1583_v1 }
  0x53   :  { %762 = vmatpush.bf16.msrb.mxu2 %v1591_v2 }
  0x54   :  { %776 = vmatpush.bf16.msrb.mxu3 %v1599_v3 }
  0x55   :  { %735 = vmatpush.bf16.msrb.mxu0 %v1574_v4 }
  0x56   :  { %749 = vmatpush.bf16.msrb.mxu1 %v1582_v5 }
  0x57   :  { %763 = vmatpush.bf16.msrb.mxu2 %v1590_v6  ;;  %v1616_v6 = vld [vmem:[#allocation8 + $0x18] sm:$0xff] }
  0x58   :  { %777 = vmatpush.bf16.msrb.mxu3 %v1598_v7  ;;  %v1615_v7 = vld [vmem:[#allocation8 + $0x10] sm:$0xff] }
  0x59   :  { %736 = vmatpush.bf16.msrb.mxu0 %v1573_v8  ;;  %v1614_v8 = vld [vmem:[#allocation8 + $0x8] sm:$0xff] }
  0x5a   :  { %750 = vmatpush.bf16.msrb.mxu1 %v1581_v9  ;;  %v1613_v9 = vld [vmem:[#allocation8] sm:$0xff] }
  0x5b   :  { %764 = vmatpush.bf16.msrb.mxu2 %v1589_v10  ;;  %v1628_v10 = vld [vmem:[#allocation10 + $0x38] sm:$0xff] }
  0x5c   :  { %778 = vmatpush.bf16.msrb.mxu3 %v1597_v11  ;;  %737 = vmatmul.bf16.vlgmr.msrb.gmra.mxu0 %v153_v20  ;;  %v1627_v11 = vld [vmem:[#allocation10 + $0x30] sm:$0xff] }
  0x5d   :  { %751 = vmatmul.bf16.vlgmr.msrb.gmra.mxu1 %v154_v21  ;;  %854 = vmatpush.bf16.msra.mxu0 %v1612_v24 }
  0x5e   :  { %765 = vmatmul.bf16.vlgmr.msrb.gmra.mxu2 %v155_v22  ;;  %945 = vmatpush.bf16.msra.mxu1 %v1620_v37 }
  0x5f   :  { %779 = vmatmul.bf16.vlgmr.msrb.gmra.mxu3 %v156_v23  ;;  %1028 = vmatpush.bf16.msra.mxu2 %v1628_v10 }
  0x61   :  { %855 = vmatpush.bf16.msra.mxu0 %v1611_v25 }
  0x62   :  { %946 = vmatpush.bf16.msra.mxu1 %v1619_v39 }
  0x63   :  { %1029 = vmatpush.bf16.msra.mxu2 %v1627_v11 }
  0x65   :  { %856 = vmatpush.bf16.msra.mxu0 %v1610_v26 }
  0x66   :  { %947 = vmatpush.bf16.msra.mxu1 %v1618_v43  ;;  %v1629_v43 = vld [vmem:[#allocation11] sm:$0xff] }
  0x67   :  { %1030 = vmatpush.bf16.msra.mxu2 %v1626_v12 }
  0x69   :  { %857 = vmatpush.bf16.msra.mxu0 %v1609_v27  ;;  %v1623_v27 = vld [vmem:[#allocation10 + $0x10] sm:$0xff] }
  0x6a   :  { %948 = vmatpush.bf16.msra.mxu1 %v1617_v49 }
  0x6b   :  { %1031 = vmatpush.bf16.msra.mxu2 %v1625_v13 }
  0x6d   :  { %858 = vmatpush.bf16.msra.mxu0 %v1608_v28  ;;  %v1622_v28 = vld [vmem:[#allocation10 + $0x8] sm:$0xff] }
  0x6e   :  { %949 = vmatpush.bf16.msra.mxu1 %v1616_v6 }
  0x6f   :  { %1032 = vmatpush.bf16.msra.mxu2 %v1624_v16 }
  0x71   :  { %859 = vmatpush.bf16.msra.mxu0 %v1607_v29  ;;  %v1621_v29 = vld [vmem:[#allocation10] sm:$0xff] }
  0x72   :  { %950 = vmatpush.bf16.msra.mxu1 %v1615_v7 }
  0x73   :  { %1033 = vmatpush.bf16.msra.mxu2 %v1623_v27 }
  0x75   :  { %860 = vmatpush.bf16.msra.mxu0 %v1606_v30  ;;  %v1636_v30 = vld [vmem:[#allocation11 + $0x38] sm:$0xff] }
  0x76   :  { %951 = vmatpush.bf16.msra.mxu1 %v1614_v8  ;;  %1119 = vmatpush.bf16.msra.mxu3 %v1636_v30 }
  0x77   :  { %1034 = vmatpush.bf16.msra.mxu2 %v1622_v28 }
  0x79   :  { %861 = vmatpush.bf16.msra.mxu0 %v1605_v33  ;;  %v1633_v33 = vld [vmem:[#allocation11 + $0x20] sm:$0xff] }
  0x7a   :  { %952 = vmatpush.bf16.msra.mxu1 %v1613_v9 }
  0x7b   :  { %1035 = vmatpush.bf16.msra.mxu2 %v1621_v29 }
  0xb9   :  { %v682_v31 = vpop.f32.mrf.mxu0 }
  0xba   :  { %v696_v32 = vpop.f32.mrf.mxu1  ;;  %v683_v40 = vadd.f32 %v1649_v36, %v682_v31  ;;  %v1635_v31 = vld [vmem:[#allocation11 + $0x30] sm:$0xff] }
  0xbb   :  { %1120 = vmatpush.bf16.msra.mxu3 %v1635_v31 }
  0xbc   :  { %v697_v44 = vadd.f32 %v696_v32, %v683_v40  ;;  %v1634_v32 = vld [vmem:[#allocation11 + $0x28] sm:$0xff]  ;;  %v1632_v40 = vld [vmem:[#allocation11 + $0x18] sm:$0xff] }
  0xbf   :  { %1121 = vmatpush.bf16.msra.mxu3 %v1634_v32 }
  0xc1   :  { %v710_v34 = vpop.f32.mrf.mxu2  ;;  %v684_v38 = vpop.f32.mrf.mxu0 }
  0xc2   :  { %v724_v35 = vpop.f32.mrf.mxu3  ;;  %v698_v41 = vpop.f32.mrf.mxu1  ;;  %v685_v42 = vadd.f32 %v1649_v36, %v684_v38  ;;  %v711_v50 = vadd.f32 %v710_v34, %v697_v44  ;;  %v1652_v44 = vld [vmem:[%s1964_s8] ss:$0 sm:$0xff]  ;;  %s1841_s8 = smov [#allocation13]  }
  0xc3   :  { %1122 = vmatpush.bf16.msra.mxu3 %v1633_v33  ;;  %s1139_s5 = sshll.u32 %s1841_s8, 4  ;;  %s1140_s5 = int_to_ptr.vmem [resolvable:$true] %s1139_s5 }
  0xc4   :  { %v699_v47 = vadd.f32 %v698_v41, %v685_v42  ;;  %v725_v53 = vadd.f32 %v724_v35, %v711_v50  ;;  %v1651_v35 = vld [vmem:[%s1962_s6] ss:$0 sm:$0xff]  ;;  %v1631_v41 = vld [vmem:[#allocation11 + $0x10] sm:$0xff]  ;;  %v1630_v42 = vld [vmem:[#allocation11 + $0x8] sm:$0xff] }
  0xc7   :  { %1123 = vmatpush.bf16.msra.mxu3 %v1632_v40 }
  0xc9   :  { %v712_v45 = vpop.f32.mrf.mxu2 }
  0xca   :  { %v726_v46 = vpop.f32.mrf.mxu3  ;;  %v713_v52 = vadd.f32 %v712_v45, %v699_v47 }
  0xcb   :  { %1124 = vmatpush.bf16.msra.mxu3 %v1631_v41 }
  0xcc   :  { %v727_v56 = vadd.f32 %v726_v46, %v713_v52 }
  0xcf   :  { %1125 = vmatpush.bf16.msra.mxu3 %v1630_v42 }
  0xd3   :  { %1126 = vmatpush.bf16.msra.mxu3 %v1629_v43 }
  0xd9   :  { %v738_v48 = vpop.f32.mrf.mxu0 }
  0xda   :  { %v752_v51 = vpop.f32.mrf.mxu1  ;;  %v739_v57 = vadd.f32 %v738_v48, %v725_v53 }
  0xdc   :  { %v753_v60 = vadd.f32 %v752_v51, %v739_v57 }
  0xe1   :  { %v766_v54 = vpop.f32.mrf.mxu2  ;;  %v740_v58 = vpop.f32.mrf.mxu0 }
  0xe2   :  { %v780_v55 = vpop.f32.mrf.mxu3  ;;  %v741_v59 = vadd.f32 %v740_v58, %v727_v56  ;;  %v754_v61 = vpop.f32.mrf.mxu1  ;;  %v767_v62 = vadd.f32 %v766_v54, %v753_v60  ;;  %v1653_v56 = vld [vmem:[%s1966_s10] ss:$0 sm:$0xff] }
  0xe4   :  { %v755_v63 = vadd.f32 %v754_v61, %v741_v59  ;;  %v781_v3 = vadd.f32 %v780_v55, %v767_v62 }
  0xe9   :  { %v768_v0 = vpop.f32.mrf.mxu2 }
  0xea   :  { %v769_v1 = vadd.f32 %v768_v0, %v755_v63  ;;  %v782_v2 = vpop.f32.mrf.mxu3 }
  0xec   :  { %v783_v4 = vadd.f32 %v782_v2, %v769_v1 }
  0xee   :  { %v785_v5 = vpack.c.bf16 %v783_v4, %v781_v3 }
  0xf0   :  { %862 = vmatmul.bf16.vlgmr.msra.gmra.mxu0 %v785_v5 }
 0x16d   :  { %v863_v15 = vpop.f32.mrf.mxu0 }
 0x16e   :  { %v864_v17 = vadd.f32 %v1650_v14, %v863_v15 }
 0x170   :  { %v870_v18 = vmul.f32 0.2, %v864_v17  ;;  %vm868_vm0 = vcmp.ge.f32.partialorder %v864_v17, 0.0 }
 0x172   :  { %v872_v21 = vsel %vm868_vm0, %v864_v17, %v870_v18 }
 0x173   :  { %v874_v24 = vadd.f32 %v872_v21, %v781_v3 }
 0x175   :  { %v865_v19 = vpop.f32.mrf.mxu0 }
 0x176   :  { %v866_v20 = vadd.f32 %v1650_v14, %v865_v19 }
 0x178   :  { %vm869_vm1 = vcmp.ge.f32.partialorder %v866_v20, 0.0  ;;  %v871_v22 = vmul.f32 0.2, %v866_v20 }
 0x17a   :  { %v873_v23 = vsel %vm869_vm1, %v866_v20, %v871_v22 }
 0x17b   :  { %v875_v25 = vadd.f32 %v873_v23, %v783_v4 }
 0x17d   :  { %v876_v26 = vpack.c.bf16 %v875_v25, %v874_v24 }
 0x17f   :  { %953 = vmatmul.bf16.vlgmr.msra.gmra.mxu1 %v876_v26 }
 0x1fc   :  { %v954_v34 = vpop.f32.mrf.mxu1 }
 0x1fd   :  { %v955_v37 = vadd.f32 %v1651_v35, %v954_v34 }
 0x204   :  { %v956_v36 = vpop.f32.mrf.mxu1 }
 0x205   :  { %v957_v38 = vadd.f32 %v1651_v35, %v956_v36 }
 0x207   :  { %v959_v39 = vpack.c.bf16 %v957_v38, %v955_v37 }
 0x209   :  { %1036 = vmatmul.bf16.vlgmr.msra.gmra.mxu2 %v959_v39 }
 0x28c   :  { %v1037_v45 = vpop.f32.mrf.mxu2 }
 0x28d   :  { %v1038_v46 = vadd.f32 %v1652_v44, %v1037_v45 }
 0x28f   :  { %v1044_v47 = vmul.f32 0.2, %v1038_v46  ;;  %vm1042_vm2 = vcmp.ge.f32.partialorder %v1038_v46, 0.0 }
 0x291   :  { %v1046_v50 = vsel %vm1042_vm2, %v1038_v46, %v1044_v47 }
 0x292   :  { %v1048_v53 = vadd.f32 %v1046_v50, %v955_v37 }
 0x294   :  { %v1039_v48 = vpop.f32.mrf.mxu2 }
 0x295   :  { %v1040_v49 = vadd.f32 %v1652_v44, %v1039_v48 }
 0x297   :  { %vm1043_vm3 = vcmp.ge.f32.partialorder %v1040_v49, 0.0  ;;  %v1045_v51 = vmul.f32 0.2, %v1040_v49 }
 0x299   :  { %v1047_v52 = vsel %vm1043_vm3, %v1040_v49, %v1045_v51 }
 0x29a   :  { %v1049_v54 = vadd.f32 %v1047_v52, %v957_v38 }
 0x29c   :  { %v1050_v55 = vpack.c.bf16 %v1049_v54, %v1048_v53 }
 0x29e   :  { %1127 = vmatmul.bf16.vlgmr.msra.gmra.mxu3 %v1050_v55 }
 0x321   :  { %v1128_v57 = vpop.f32.mrf.mxu3 }
 0x322   :  { %v1129_v58 = vadd.f32 %v1653_v56, %v1128_v57 }
 0x324   :  { %1133 = vst [vmem:[#allocation13] sm:$0xff] %v1129_v58 }
 0x329   :  { %v1130_v59 = vpop.f32.mrf.mxu3 }
 0x32a   :  { %v1131_v60 = vadd.f32 %v1653_v56, %v1130_v59 }
 0x32c   :  { %1134 = vst [vmem:[#allocation13 + $0x8] sm:$0xff] %v1131_v60 }
 0x32d   :  { %1147 = dma.vmem_to_hbm [thread:$0]  %s1140_s5, 256, %s1142_s14, [#allocation4], %s1842_s15, %s1842_s15, %s1843_s16  }
 0x32e   :  { %1830 = dma.done.wait [#allocation4], 256  }
 0x32f   :  { %1831 = vsyncadd [#allocation4], 4294967040 }
 0x330   :  { %1152 = vsyncpa [#allocation3], 1 }
 0x331   :  { %1153 = vsyncpa [#allocation6], 1 }
 0x332   :  { %1154 = vsyncpa [#allocation9], 1 }
 0x333   :  { %1155 = vsyncpa [#allocation12], 1 }
 0x334   :  { %1156 = vsyncpa [#allocation4], 1 }

// kernel: tpu_custom_call.1
= control target key start
LH: loop header
LB: loop body
LE: loop exit
PB: predicated region body
PF: predicated region fallthrough
CT: control target
= control target key end

     0   :  { %16 = vsyncpa [#allocation3], 0  ;;  %s1956_s0 = inlined_call_operand.hbm [shape: f32[16,1024], index: 0, kind: input, shape index: {}]   ;;  %s1957_s1 = inlined_call_operand.hbm [shape: bf16[1024,128], index: 1, kind: input, shape index: {}]   ;;  %s1958_s2 = inlined_call_operand.vmem [shape: f32[1,128], index: 2, kind: input, shape index: {}]   ;;  %s1959_s3 = inlined_call_operand.hbm [shape: bf16[128,128], index: 3, kind: input, shape index: {}]   ;;  %s1960_s4 = inlined_call_operand.vmem [shape: f32[1,128], index: 4, kind: input, shape index: {}]   ;;  %s1961_s5 = inlined_call_operand.hbm [shape: bf16[128,128], index: 5, kind: input, shape index: {}]   ;;  %s1962_s6 = inlined_call_operand.vmem [shape: f32[1,128], index: 6, kind: input, shape index: {}]   ;;  %s1963_s7 = inlined_call_operand.hbm [shape: bf16[128,128], index: 7, kind: input, shape index: {}]   ;;  %s1964_s8 = inlined_call_operand.vmem [shape: f32[1,128], index: 8, kind: input, shape index: {}]   ;;  %s1965_s9 = inlined_call_operand.hbm [shape: bf16[128,128], index: 9, kind: input, shape index: {}]   ;;  %s1966_s10 = inlined_call_operand.vmem [shape: f32[1,128], index: 10, kind: input, shape index: {}]   ;;  %s1967_s11 = inlined_call_operand.hbm [shape: f32[16,128], index: 11, kind: output, shape index: {}]  }
   0x1   :  { %17 = vsyncpa [#allocation6], 0 }
   0x2   :  { %18 = vsyncpa [#allocation9], 0 }
   0x3   :  { %19 = vsyncpa [#allocation12], 0  ;;  %s38_s19 = sshll.u32 %s1957_s1, 4  ;;  %s39_s19 = int_to_ptr.hbm [resolvable:$true] %s38_s19 }
   0x4   :  { %20 = vsyncpa [#allocation4], 0  ;;  %s1832_s20 = smov [#allocation5]   ;;  %s68_s24 = sshll.u32 %s1961_s5, 4  ;;  %s69_s24 = int_to_ptr.hbm [resolvable:$true] %s68_s24 }
   0x5   :  { %s40_s21 = sshll.u32 %s1832_s20, 4  ;;  %s1833_s25 = smov 64   ;;  %s41_s21 = int_to_ptr.vmem [resolvable:$true] %s40_s21 }
   0x6   :  { %s1834_s26 = smov 4   ;;  %s1835_s27 = smov [#allocation8]  }
   0x7   :  { %46 = dma.hbm_to_vmem [thread:$0]  %s39_s19, 8192, %s41_s21, [#allocation6], %s1833_s25, %s1833_s25, %s1834_s26  }
   0x8   :  { %s70_s28 = sshll.u32 %s1835_s27, 4  ;;  %s25_s30 = sshll.u32 %s1956_s0, 4  ;;  %s71_s28 = int_to_ptr.vmem [resolvable:$true] %s70_s28  ;;  %s26_s30 = int_to_ptr.hbm [resolvable:$true] %s25_s30 }
   0x9   :  { %76 = dma.hbm_to_vmem [thread:$0]  %s69_s24, 1024, %s71_s28, [#allocation9], %s1833_s25, %s1833_s25, %s1834_s26  }
   0xa   :  { %s1836_s5 = smov [#allocation2]   ;;  %s53_s15 = sshll.u32 %s1959_s3, 4  ;;  %s54_s15 = int_to_ptr.hbm [resolvable:$true] %s53_s15 }
   0xb   :  { %s27_s12 = sshll.u32 %s1836_s5, 4  ;;  %s1837_s16 = smov 1024   ;;  %s28_s12 = int_to_ptr.vmem [resolvable:$true] %s27_s12 }
   0xc   :  { %33 = dma.hbm_to_vmem [thread:$0]  %s26_s30, 2048, %s28_s12, [#allocation3], %s1837_s16, %s1837_s16, %s1833_s25  }
   0xd   :  { %s83_s0 = sshll.u32 %s1963_s7, 4  ;;  %s1838_s19 = smov [#allocation7]   ;;  %s84_s0 = int_to_ptr.hbm [resolvable:$true] %s83_s0 }
   0xe   :  { %s55_s20 = sshll.u32 %s1838_s19, 4  ;;  %s1839_s21 = smov [#allocation10]   ;;  %s56_s20 = int_to_ptr.vmem [resolvable:$true] %s55_s20 }
   0xf   :  { %61 = dma.hbm_to_vmem [thread:$0]  %s54_s15, 1024, %s56_s20, [#allocation6], %s1833_s25, %s1833_s25, %s1834_s26  }
  0x10   :  { %s85_s22 = sshll.u32 %s1839_s21, 4  ;;  %s98_s24 = sshll.u32 %s1965_s9, 4  ;;  %s86_s22 = int_to_ptr.vmem [resolvable:$true] %s85_s22  ;;  %s99_s24 = int_to_ptr.hbm [resolvable:$true] %s98_s24 }
  0x11   :  { %91 = dma.hbm_to_vmem [thread:$0]  %s84_s0, 1024, %s86_s22, [#allocation9], %s1833_s25, %s1833_s25, %s1834_s26  }
  0x12   :  { %s1840_s7 = smov [#allocation11]  }
  0x13   :  { %s100_s27 = sshll.u32 %s1840_s7, 4  ;;  %s101_s27 = int_to_ptr.vmem [resolvable:$true] %s100_s27 }
  0x14   :  { %106 = dma.hbm_to_vmem [thread:$0]  %s99_s24, 1024, %s101_s27, [#allocation12], %s1833_s25, %s1833_s25, %s1834_s26  }
  0x15   :  { %1822 = dma.done.wait [#allocation3], 2048  }
  0x16   :  { %1823 = vsyncadd [#allocation3], 4294965248 }
  0x17   :  { %1824 = dma.done.wait [#allocation6], 9216  }
  0x18   :  { %1825 = vsyncadd [#allocation6], 4294958080 }
  0x19   :  { %1826 = dma.done.wait [#allocation9], 2048  }
  0x1a   :  { %1827 = vsyncadd [#allocation9], 4294965248 }
  0x1b   :  { %1828 = dma.done.wait [#allocation12], 1024  }
  0x1c   :  { %1829 = vsyncadd [#allocation12], 4294966272  ;;  %v1548_v0 = vld [vmem:[#allocation5 + $0x38] sm:$0xff]  ;;  %v1547_v4 = vld [vmem:[#allocation5 + $0x30] sm:$0xff]  ;;  %s1141_s14 = sshll.u32 %s1967_s11, 4  ;;  %s1842_s15 = smov 128   ;;  %s1142_s14 = int_to_ptr.hbm [resolvable:$true] %s1141_s14 }
  0x1d   :  { %v1556_v1 = vld [vmem:[#allocation5 + $0x78] sm:$0xff]  ;;  %673 = vmatpush.bf16.msra.mxu0 %v1548_v0  ;;  %v1555_v5 = vld [vmem:[#allocation5 + $0x70] sm:$0xff]  ;;  %v1546_v8 = vld [vmem:[#allocation5 + $0x28] sm:$0xff]  ;;  %s1843_s16 = smov 8  }
  0x1e   :  { %v1564_v2 = vld [vmem:[#allocation5 + $0xb8] sm:$0xff]  ;;  %687 = vmatpush.bf16.msra.mxu1 %v1556_v1  ;;  %v1563_v6 = vld [vmem:[#allocation5 + $0xb0] sm:$0xff]  ;;  %v1554_v9 = vld [vmem:[#allocation5 + $0x68] sm:$0xff] }
  0x1f   :  { %v1572_v3 = vld [vmem:[#allocation5 + $0xf8] sm:$0xff]  ;;  %701 = vmatpush.bf16.msra.mxu2 %v1564_v2  ;;  %v1571_v7 = vld [vmem:[#allocation5 + $0xf0] sm:$0xff]  ;;  %v1562_v10 = vld [vmem:[#allocation5 + $0xa8] sm:$0xff] }
  0x20   :  { %715 = vmatpush.bf16.msra.mxu3 %v1572_v3  ;;  %v1570_v11 = vld [vmem:[#allocation5 + $0xe8] sm:$0xff]  ;;  %v1545_v12 = vld [vmem:[#allocation5 + $0x20] sm:$0xff]  ;;  %v1544_v16 = vld [vmem:[#allocation5 + $0x18] sm:$0xff] }
  0x21   :  { %674 = vmatpush.bf16.msra.mxu0 %v1547_v4  ;;  %v1553_v13 = vld [vmem:[#allocation5 + $0x60] sm:$0xff]  ;;  %v1552_v17 = vld [vmem:[#allocation5 + $0x58] sm:$0xff]  ;;  %v1543_v20 = vld [vmem:[#allocation5 + $0x10] sm:$0xff] }
  0x22   :  { %688 = vmatpush.bf16.msra.mxu1 %v1555_v5  ;;  %v1561_v14 = vld [vmem:[#allocation5 + $0xa0] sm:$0xff]  ;;  %v1560_v18 = vld [vmem:[#allocation5 + $0x98] sm:$0xff]  ;;  %v1551_v21 = vld [vmem:[#allocation5 + $0x50] sm:$0xff] }
  0x23   :  { %702 = vmatpush.bf16.msra.mxu2 %v1563_v6  ;;  %v1569_v15 = vld [vmem:[#allocation5 + $0xe0] sm:$0xff]  ;;  %v1568_v19 = vld [vmem:[#allocation5 + $0xd8] sm:$0xff]  ;;  %v1559_v22 = vld [vmem:[#allocation5 + $0x90] sm:$0xff] }
  0x24   :  { %716 = vmatpush.bf16.msra.mxu3 %v1571_v7  ;;  %v1567_v23 = vld [vmem:[#allocation5 + $0xd0] sm:$0xff]  ;;  %v1542_v24 = vld [vmem:[#allocation5 + $0x8] sm:$0xff]  ;;  %v1541_v28 = vld [vmem:[#allocation5] sm:$0xff] }
  0x25   :  { %675 = vmatpush.bf16.msra.mxu0 %v1546_v8  ;;  %v1550_v25 = vld [vmem:[#allocation5 + $0x48] sm:$0xff]  ;;  %v1549_v29 = vld [vmem:[#allocation5 + $0x40] sm:$0xff]  ;;  %v1580_v32 = vld [vmem:[#allocation5 + $0x138] sm:$0xff] }
  0x26   :  { %689 = vmatpush.bf16.msra.mxu1 %v1554_v9  ;;  %v1558_v26 = vld [vmem:[#allocation5 + $0x88] sm:$0xff]  ;;  %v1557_v30 = vld [vmem:[#allocation5 + $0x80] sm:$0xff]  ;;  %v1588_v33 = vld [vmem:[#allocation5 + $0x178] sm:$0xff] }
  0x27   :  { %703 = vmatpush.bf16.msra.mxu2 %v1562_v10  ;;  %v1566_v27 = vld [vmem:[#allocation5 + $0xc8] sm:$0xff]  ;;  %v1565_v31 = vld [vmem:[#allocation5 + $0xc0] sm:$0xff]  ;;  %v135_v34 = vld [vmem:[#allocation2 + $0x10] sm:$0xff] }
  0x28   :  { %717 = vmatpush.bf16.msra.mxu3 %v1570_v11  ;;  %v143_v35 = vld [vmem:[#allocation2 + $0x50] sm:$0xff]  ;;  %v133_v36 = vld [vmem:[#allocation2] sm:$0xff]  ;;  %v136_v38 = vld [vmem:[#allocation2 + $0x18] sm:$0xff] }
  0x29   :  { %676 = vmatpush.bf16.msra.mxu0 %v1545_v12  ;;  %v141_v37 = vld [vmem:[#allocation2 + $0x40] sm:$0xff]  ;;  %v144_v39 = vld [vmem:[#allocation2 + $0x58] sm:$0xff]  ;;  %v134_v40 = vld [vmem:[#allocation2 + $0x8] sm:$0xff]  ;;  %v151_v44 = vpack.c.bf16 %v143_v35, %v135_v34 }
  0x2a   :  { %690 = vmatpush.bf16.msra.mxu1 %v1553_v13  ;;  %v142_v41 = vld [vmem:[#allocation2 + $0x48] sm:$0xff]  ;;  %v1596_v42 = vld [vmem:[#allocation5 + $0x1b8] sm:$0xff]  ;;  %v149_v45 = vpack.c.bf16 %v141_v37, %v133_v36  ;;  %v152_v46 = vpack.c.bf16 %v144_v39, %v136_v38  ;;  %v1579_v48 = vld [vmem:[#allocation5 + $0x130] sm:$0xff] }
  0x2b   :  { %704 = vmatpush.bf16.msra.mxu2 %v1561_v14  ;;  %v1604_v43 = vld [vmem:[#allocation5 + $0x1f8] sm:$0xff]  ;;  %v150_v47 = vpack.c.bf16 %v142_v41, %v134_v40  ;;  %v1587_v49 = vld [vmem:[#allocation5 + $0x170] sm:$0xff]  ;;  %v1578_v52 = vld [vmem:[#allocation5 + $0x128] sm:$0xff] }
  0x2c   :  { %718 = vmatpush.bf16.msra.mxu3 %v1569_v15  ;;  %v1595_v50 = vld [vmem:[#allocation5 + $0x1b0] sm:$0xff]  ;;  %v1586_v53 = vld [vmem:[#allocation5 + $0x168] sm:$0xff]  ;;  %v1577_v56 = vld [vmem:[#allocation5 + $0x120] sm:$0xff] }
  0x2d   :  { %677 = vmatpush.bf16.msra.mxu0 %v1544_v16  ;;  %v1603_v51 = vld [vmem:[#allocation5 + $0x1f0] sm:$0xff]  ;;  %v1594_v54 = vld [vmem:[#allocation5 + $0x1a8] sm:$0xff]  ;;  %v1585_v57 = vld [vmem:[#allocation5 + $0x160] sm:$0xff] }
  0x2e   :  { %691 = vmatpush.bf16.msra.mxu1 %v1552_v17  ;;  %v1602_v55 = vld [vmem:[#allocation5 + $0x1e8] sm:$0xff]  ;;  %v1593_v58 = vld [vmem:[#allocation5 + $0x1a0] sm:$0xff]  ;;  %v1576_v60 = vld [vmem:[#allocation5 + $0x118] sm:$0xff] }
  0x2f   :  { %705 = vmatpush.bf16.msra.mxu2 %v1560_v18  ;;  %v1601_v59 = vld [vmem:[#allocation5 + $0x1e0] sm:$0xff]  ;;  %v1584_v61 = vld [vmem:[#allocation5 + $0x158] sm:$0xff]  ;;  %v1575_v0 = vld [vmem:[#allocation5 + $0x110] sm:$0xff] }
  0x30   :  { %719 = vmatpush.bf16.msra.mxu3 %v1568_v19  ;;  %v1592_v62 = vld [vmem:[#allocation5 + $0x198] sm:$0xff]  ;;  %v1583_v1 = vld [vmem:[#allocation5 + $0x150] sm:$0xff]  ;;  %v1574_v4 = vld [vmem:[#allocation5 + $0x108] sm:$0xff] }
  0x31   :  { %678 = vmatpush.bf16.msra.mxu0 %v1543_v20  ;;  %v1600_v63 = vld [vmem:[#allocation5 + $0x1d8] sm:$0xff]  ;;  %v1591_v2 = vld [vmem:[#allocation5 + $0x190] sm:$0xff]  ;;  %v1582_v5 = vld [vmem:[#allocation5 + $0x148] sm:$0xff] }
  0x32   :  { %692 = vmatpush.bf16.msra.mxu1 %v1551_v21  ;;  %v1599_v3 = vld [vmem:[#allocation5 + $0x1d0] sm:$0xff]  ;;  %v1590_v6 = vld [vmem:[#allocation5 + $0x188] sm:$0xff]  ;;  %v1573_v8 = vld [vmem:[#allocation5 + $0x100] sm:$0xff] }
  0x33   :  { %706 = vmatpush.bf16.msra.mxu2 %v1559_v22  ;;  %v1598_v7 = vld [vmem:[#allocation5 + $0x1c8] sm:$0xff]  ;;  %v1581_v9 = vld [vmem:[#allocation5 + $0x140] sm:$0xff]  ;;  %v139_v16 = vld [vmem:[#allocation2 + $0x30] sm:$0xff] }
  0x34   :  { %720 = vmatpush.bf16.msra.mxu3 %v1567_v23  ;;  %v1589_v10 = vld [vmem:[#allocation5 + $0x180] sm:$0xff]  ;;  %v138_v14 = vld [vmem:[#allocation2 + $0x28] sm:$0xff]  ;;  %v147_v17 = vld [vmem:[#allocation2 + $0x70] sm:$0xff] }
  0x35   :  { %679 = vmatpush.bf16.msra.mxu0 %v1542_v24  ;;  %v1597_v11 = vld [vmem:[#allocation5 + $0x1c0] sm:$0xff]  ;;  %v146_v15 = vld [vmem:[#allocation2 + $0x68] sm:$0xff]  ;;  %v140_v18 = vld [vmem:[#allocation2 + $0x38] sm:$0xff]  ;;  %v155_v22 = vpack.c.bf16 %v147_v17, %v139_v16 }
  0x36   :  { %693 = vmatpush.bf16.msra.mxu1 %v1550_v25  ;;  %v137_v12 = vld [vmem:[#allocation2 + $0x20] sm:$0xff]  ;;  %v148_v19 = vld [vmem:[#allocation2 + $0x78] sm:$0xff]  ;;  %v154_v21 = vpack.c.bf16 %v146_v15, %v138_v14  ;;  %v1611_v25 = vld [vmem:[#allocation7 + $0x30] sm:$0xff] }
  0x37   :  { %707 = vmatpush.bf16.msra.mxu2 %v1558_v26  ;;  %v145_v13 = vld [vmem:[#allocation2 + $0x60] sm:$0xff]  ;;  %v156_v23 = vpack.c.bf16 %v148_v19, %v140_v18  ;;  %v1612_v24 = vld [vmem:[#allocation7 + $0x38] sm:$0xff]  ;;  %v1610_v26 = vld [vmem:[#allocation7 + $0x28] sm:$0xff] }
  0x38   :  { %721 = vmatpush.bf16.msra.mxu3 %v1566_v27  ;;  %v153_v20 = vpack.c.bf16 %v145_v13, %v137_v12  ;;  %v1609_v27 = vld [vmem:[#allocation7 + $0x20] sm:$0xff]  ;;  %v1620_v37 = vld [vmem:[#allocation8 + $0x38] sm:$0xff]  ;;  %v1619_v39 = vld [vmem:[#allocation8 + $0x30] sm:$0xff] }
  0x39   :  { %680 = vmatpush.bf16.msra.mxu0 %v1541_v28  ;;  %v1608_v28 = vld [vmem:[#allocation7 + $0x18] sm:$0xff]  ;;  %v1649_v36 = vld [vmem:[%s1958_s2] ss:$0 sm:$0xff]  ;;  %v1626_v12 = vld [vmem:[#allocation10 + $0x28] sm:$0xff] }
  0x3a   :  { %694 = vmatpush.bf16.msra.mxu1 %v1549_v29  ;;  %v1607_v29 = vld [vmem:[#allocation7 + $0x10] sm:$0xff]  ;;  %v1625_v13 = vld [vmem:[#allocation10 + $0x20] sm:$0xff]  ;;  %v1624_v16 = vld [vmem:[#allocation10 + $0x18] sm:$0xff] }
  0x3b   :  { %708 = vmatpush.bf16.msra.mxu2 %v1557_v30  ;;  %v1606_v30 = vld [vmem:[#allocation7 + $0x8] sm:$0xff]  ;;  %v1650_v14 = vld [vmem:[%s1960_s4] ss:$0 sm:$0xff] }
  0x3c   :  { %722 = vmatpush.bf16.msra.mxu3 %v1565_v31  ;;  %681 = vmatmul.bf16.vlgmr.msra.gmra.mxu0 %v149_v45 }
  0x3d   :  { %729 = vmatpush.bf16.msrb.mxu0 %v1580_v32  ;;  %695 = vmatmul.bf16.vlgmr.msra.gmra.mxu1 %v150_v47 }
  0x3e   :  { %743 = vmatpush.bf16.msrb.mxu1 %v1588_v33  ;;  %709 = vmatmul.bf16.vlgmr.msra.gmra.mxu2 %v151_v44  ;;  %v1605_v33 = vld [vmem:[#allocation7] sm:$0xff] }
  0x3f   :  { %757 = vmatpush.bf16.msrb.mxu2 %v1596_v42  ;;  %723 = vmatmul.bf16.vlgmr.msra.gmra.mxu3 %v152_v46 }
  0x40   :  { %771 = vmatpush.bf16.msrb.mxu3 %v1604_v43  ;;  %v1618_v43 = vld [vmem:[#allocation8 + $0x28] sm:$0xff] }
  0x41   :  { %730 = vmatpush.bf16.msrb.mxu0 %v1579_v48 }
  0x42   :  { %744 = vmatpush.bf16.msrb.mxu1 %v1587_v49  ;;  %v1617_v49 = vld [vmem:[#allocation8 + $0x20] sm:$0xff] }
  0x43   :  { %758 = vmatpush.bf16.msrb.mxu2 %v1595_v50 }
  0x44   :  { %772 = vmatpush.bf16.msrb.mxu3 %v1603_v51 }
  0x45   :  { %731 = vmatpush.bf16.msrb.mxu0 %v1578_v52 }
  0x46   :  { %745 = vmatpush.bf16.msrb.mxu1 %v1586_v53 }
  0x47   :  { %759 = vmatpush.bf16.msrb.mxu2 %v1594_v54 }
  0x48   :  { %773 = vmatpush.bf16.msrb.mxu3 %v1602_v55 }
  0x49   :  { %732 = vmatpush.bf16.msrb.mxu0 %v1577_v56 }
  0x4a   :  { %746 = vmatpush.bf16.msrb.mxu1 %v1585_v57 }
  0x4b   :  { %760 = vmatpush.bf16.msrb.mxu2 %v1593_v58 }
  0x4c   :  { %774 = vmatpush.bf16.msrb.mxu3 %v1601_v59 }
  0x4d   :  { %733 = vmatpush.bf16.msrb.mxu0 %v1576_v60 }
  0x4e   :  { %747 = vmatpush.bf16.msrb.mxu1 %v1584_v61 }
  0x4f   :  { %761 = vmatpush.bf16.msrb.mxu2 %v1592_v62 }
  0x50   :  { %775 = vmatpush.bf16.msrb.mxu3 %v1600_v63 }
  0x51   :  { %734 = vmatpush.bf16.msrb.mxu0 %v1575_v0 }
  0x52   :  { %748 = vmatpush.bf16.msrb.mxu1 %v1583_v1 }
  0x53   :  { %762 = vmatpush.bf16.msrb.mxu2 %v1591_v2 }
  0x54   :  { %776 = vmatpush.bf16.msrb.mxu3 %v1599_v3 }
  0x55   :  { %735 = vmatpush.bf16.msrb.mxu0 %v1574_v4 }
  0x56   :  { %749 = vmatpush.bf16.msrb.mxu1 %v1582_v5 }
  0x57   :  { %763 = vmatpush.bf16.msrb.mxu2 %v1590_v6  ;;  %v1616_v6 = vld [vmem:[#allocation8 + $0x18] sm:$0xff] }
  0x58   :  { %777 = vmatpush.bf16.msrb.mxu3 %v1598_v7  ;;  %v1615_v7 = vld [vmem:[#allocation8 + $0x10] sm:$0xff] }
  0x59   :  { %736 = vmatpush.bf16.msrb.mxu0 %v1573_v8  ;;  %v1614_v8 = vld [vmem:[#allocation8 + $0x8] sm:$0xff] }
  0x5a   :  { %750 = vmatpush.bf16.msrb.mxu1 %v1581_v9  ;;  %v1613_v9 = vld [vmem:[#allocation8] sm:$0xff] }
  0x5b   :  { %764 = vmatpush.bf16.msrb.mxu2 %v1589_v10  ;;  %v1628_v10 = vld [vmem:[#allocation10 + $0x38] sm:$0xff] }
  0x5c   :  { %778 = vmatpush.bf16.msrb.mxu3 %v1597_v11  ;;  %737 = vmatmul.bf16.vlgmr.msrb.gmra.mxu0 %v153_v20  ;;  %v1627_v11 = vld [vmem:[#allocation10 + $0x30] sm:$0xff] }
  0x5d   :  { %751 = vmatmul.bf16.vlgmr.msrb.gmra.mxu1 %v154_v21  ;;  %854 = vmatpush.bf16.msra.mxu0 %v1612_v24 }
  0x5e   :  { %765 = vmatmul.bf16.vlgmr.msrb.gmra.mxu2 %v155_v22  ;;  %945 = vmatpush.bf16.msra.mxu1 %v1620_v37 }
  0x5f   :  { %779 = vmatmul.bf16.vlgmr.msrb.gmra.mxu3 %v156_v23  ;;  %1028 = vmatpush.bf16.msra.mxu2 %v1628_v10 }
  0x61   :  { %855 = vmatpush.bf16.msra.mxu0 %v1611_v25 }
  0x62   :  { %946 = vmatpush.bf16.msra.mxu1 %v1619_v39 }
  0x63   :  { %1029 = vmatpush.bf16.msra.mxu2 %v1627_v11 }
  0x65   :  { %856 = vmatpush.bf16.msra.mxu0 %v1610_v26 }
  0x66   :  { %947 = vmatpush.bf16.msra.mxu1 %v1618_v43  ;;  %v1629_v43 = vld [vmem:[#allocation11] sm:$0xff] }
  0x67   :  { %1030 = vmatpush.bf16.msra.mxu2 %v1626_v12 }
  0x69   :  { %857 = vmatpush.bf16.msra.mxu0 %v1609_v27  ;;  %v1623_v27 = vld [vmem:[#allocation10 + $0x10] sm:$0xff] }
  0x6a   :  { %948 = vmatpush.bf16.msra.mxu1 %v1617_v49 }
  0x6b   :  { %1031 = vmatpush.bf16.msra.mxu2 %v1625_v13 }
  0x6d   :  { %858 = vmatpush.bf16.msra.mxu0 %v1608_v28  ;;  %v1622_v28 = vld [vmem:[#allocation10 + $0x8] sm:$0xff] }
  0x6e   :  { %949 = vmatpush.bf16.msra.mxu1 %v1616_v6 }
  0x6f   :  { %1032 = vmatpush.bf16.msra.mxu2 %v1624_v16 }
  0x71   :  { %859 = vmatpush.bf16.msra.mxu0 %v1607_v29  ;;  %v1621_v29 = vld [vmem:[#allocation10] sm:$0xff] }
  0x72   :  { %950 = vmatpush.bf16.msra.mxu1 %v1615_v7 }
  0x73   :  { %1033 = vmatpush.bf16.msra.mxu2 %v1623_v27 }
  0x75   :  { %860 = vmatpush.bf16.msra.mxu0 %v1606_v30  ;;  %v1636_v30 = vld [vmem:[#allocation11 + $0x38] sm:$0xff] }
  0x76   :  { %951 = vmatpush.bf16.msra.mxu1 %v1614_v8  ;;  %1119 = vmatpush.bf16.msra.mxu3 %v1636_v30 }
  0x77   :  { %1034 = vmatpush.bf16.msra.mxu2 %v1622_v28 }
  0x79   :  { %861 = vmatpush.bf16.msra.mxu0 %v1605_v33  ;;  %v1633_v33 = vld [vmem:[#allocation11 + $0x20] sm:$0xff] }
  0x7a   :  { %952 = vmatpush.bf16.msra.mxu1 %v1613_v9 }
  0x7b   :  { %1035 = vmatpush.bf16.msra.mxu2 %v1621_v29 }
  0xb9   :  { %v682_v31 = vpop.f32.mrf.mxu0 }
  0xba   :  { %v696_v32 = vpop.f32.mrf.mxu1  ;;  %v683_v40 = vadd.f32 %v1649_v36, %v682_v31  ;;  %v1635_v31 = vld [vmem:[#allocation11 + $0x30] sm:$0xff] }
  0xbb   :  { %1120 = vmatpush.bf16.msra.mxu3 %v1635_v31 }
  0xbc   :  { %v697_v44 = vadd.f32 %v696_v32, %v683_v40  ;;  %v1634_v32 = vld [vmem:[#allocation11 + $0x28] sm:$0xff]  ;;  %v1632_v40 = vld [vmem:[#allocation11 + $0x18] sm:$0xff] }
  0xbf   :  { %1121 = vmatpush.bf16.msra.mxu3 %v1634_v32 }
  0xc1   :  { %v710_v34 = vpop.f32.mrf.mxu2  ;;  %v684_v38 = vpop.f32.mrf.mxu0 }
  0xc2   :  { %v724_v35 = vpop.f32.mrf.mxu3  ;;  %v698_v41 = vpop.f32.mrf.mxu1  ;;  %v685_v42 = vadd.f32 %v1649_v36, %v684_v38  ;;  %v711_v50 = vadd.f32 %v710_v34, %v697_v44  ;;  %v1652_v44 = vld [vmem:[%s1964_s8] ss:$0 sm:$0xff]  ;;  %s1841_s8 = smov [#allocation13]  }
  0xc3   :  { %1122 = vmatpush.bf16.msra.mxu3 %v1633_v33  ;;  %s1139_s5 = sshll.u32 %s1841_s8, 4  ;;  %s1140_s5 = int_to_ptr.vmem [resolvable:$true] %s1139_s5 }
  0xc4   :  { %v699_v47 = vadd.f32 %v698_v41, %v685_v42  ;;  %v725_v53 = vadd.f32 %v724_v35, %v711_v50  ;;  %v1651_v35 = vld [vmem:[%s1962_s6] ss:$0 sm:$0xff]  ;;  %v1631_v41 = vld [vmem:[#allocation11 + $0x10] sm:$0xff]  ;;  %v1630_v42 = vld [vmem:[#allocation11 + $0x8] sm:$0xff] }
  0xc7   :  { %1123 = vmatpush.bf16.msra.mxu3 %v1632_v40 }
  0xc9   :  { %v712_v45 = vpop.f32.mrf.mxu2 }
  0xca   :  { %v726_v46 = vpop.f32.mrf.mxu3  ;;  %v713_v52 = vadd.f32 %v712_v45, %v699_v47 }
  0xcb   :  { %1124 = vmatpush.bf16.msra.mxu3 %v1631_v41 }
  0xcc   :  { %v727_v56 = vadd.f32 %v726_v46, %v713_v52 }
  0xcf   :  { %1125 = vmatpush.bf16.msra.mxu3 %v1630_v42 }
  0xd3   :  { %1126 = vmatpush.bf16.msra.mxu3 %v1629_v43 }
  0xd9   :  { %v738_v48 = vpop.f32.mrf.mxu0 }
  0xda   :  { %v752_v51 = vpop.f32.mrf.mxu1  ;;  %v739_v57 = vadd.f32 %v738_v48, %v725_v53 }
  0xdc   :  { %v753_v60 = vadd.f32 %v752_v51, %v739_v57 }
  0xe1   :  { %v766_v54 = vpop.f32.mrf.mxu2  ;;  %v740_v58 = vpop.f32.mrf.mxu0 }
  0xe2   :  { %v780_v55 = vpop.f32.mrf.mxu3  ;;  %v741_v59 = vadd.f32 %v740_v58, %v727_v56  ;;  %v754_v61 = vpop.f32.mrf.mxu1  ;;  %v767_v62 = vadd.f32 %v766_v54, %v753_v60  ;;  %v1653_v56 = vld [vmem:[%s1966_s10] ss:$0 sm:$0xff] }
  0xe4   :  { %v755_v63 = vadd.f32 %v754_v61, %v741_v59  ;;  %v781_v3 = vadd.f32 %v780_v55, %v767_v62 }
  0xe9   :  { %v768_v0 = vpop.f32.mrf.mxu2 }
  0xea   :  { %v769_v1 = vadd.f32 %v768_v0, %v755_v63  ;;  %v782_v2 = vpop.f32.mrf.mxu3 }
  0xec   :  { %v783_v4 = vadd.f32 %v782_v2, %v769_v1 }
  0xee   :  { %v785_v5 = vpack.c.bf16 %v783_v4, %v781_v3 }
  0xf0   :  { %862 = vmatmul.bf16.vlgmr.msra.gmra.mxu0 %v785_v5 }
 0x16d   :  { %v863_v15 = vpop.f32.mrf.mxu0 }
 0x16e   :  { %v864_v17 = vadd.f32 %v1650_v14, %v863_v15 }
 0x170   :  { %v870_v18 = vmul.f32 0.2, %v864_v17  ;;  %vm868_vm0 = vcmp.ge.f32.partialorder %v864_v17, 0.0 }
 0x172   :  { %v872_v21 = vsel %vm868_vm0, %v864_v17, %v870_v18 }
 0x173   :  { %v874_v24 = vadd.f32 %v872_v21, %v781_v3 }
 0x175   :  { %v865_v19 = vpop.f32.mrf.mxu0 }
 0x176   :  { %v866_v20 = vadd.f32 %v1650_v14, %v865_v19 }
 0x178   :  { %vm869_vm1 = vcmp.ge.f32.partialorder %v866_v20, 0.0  ;;  %v871_v22 = vmul.f32 0.2, %v866_v20 }
 0x17a   :  { %v873_v23 = vsel %vm869_vm1, %v866_v20, %v871_v22 }
 0x17b   :  { %v875_v25 = vadd.f32 %v873_v23, %v783_v4 }
 0x17d   :  { %v876_v26 = vpack.c.bf16 %v875_v25, %v874_v24 }
 0x17f   :  { %953 = vmatmul.bf16.vlgmr.msra.gmra.mxu1 %v876_v26 }
 0x1fc   :  { %v954_v34 = vpop.f32.mrf.mxu1 }
 0x1fd   :  { %v955_v37 = vadd.f32 %v1651_v35, %v954_v34 }
 0x204   :  { %v956_v36 = vpop.f32.mrf.mxu1 }
 0x205   :  { %v957_v38 = vadd.f32 %v1651_v35, %v956_v36 }
 0x207   :  { %v959_v39 = vpack.c.bf16 %v957_v38, %v955_v37 }
 0x209   :  { %1036 = vmatmul.bf16.vlgmr.msra.gmra.mxu2 %v959_v39 }
 0x28c   :  { %v1037_v45 = vpop.f32.mrf.mxu2 }
 0x28d   :  { %v1038_v46 = vadd.f32 %v1652_v44, %v1037_v45 }
 0x28f   :  { %v1044_v47 = vmul.f32 0.2, %v1038_v46  ;;  %vm1042_vm2 = vcmp.ge.f32.partialorder %v1038_v46, 0.0 }
 0x291   :  { %v1046_v50 = vsel %vm1042_vm2, %v1038_v46, %v1044_v47 }
 0x292   :  { %v1048_v53 = vadd.f32 %v1046_v50, %v955_v37 }
 0x294   :  { %v1039_v48 = vpop.f32.mrf.mxu2 }
 0x295   :  { %v1040_v49 = vadd.f32 %v1652_v44, %v1039_v48 }
 0x297   :  { %vm1043_vm3 = vcmp.ge.f32.partialorder %v1040_v49, 0.0  ;;  %v1045_v51 = vmul.f32 0.2, %v1040_v49 }
 0x299   :  { %v1047_v52 = vsel %vm1043_vm3, %v1040_v49, %v1045_v51 }
 0x29a   :  { %v1049_v54 = vadd.f32 %v1047_v52, %v957_v38 }
 0x29c   :  { %v1050_v55 = vpack.c.bf16 %v1049_v54, %v1048_v53 }
 0x29e   :  { %1127 = vmatmul.bf16.vlgmr.msra.gmra.mxu3 %v1050_v55 }
 0x321   :  { %v1128_v57 = vpop.f32.mrf.mxu3 }
 0x322   :  { %v1129_v58 = vadd.f32 %v1653_v56, %v1128_v57 }
 0x324   :  { %1133 = vst [vmem:[#allocation13] sm:$0xff] %v1129_v58 }
 0x329   :  { %v1130_v59 = vpop.f32.mrf.mxu3 }
 0x32a   :  { %v1131_v60 = vadd.f32 %v1653_v56, %v1130_v59 }
 0x32c   :  { %1134 = vst [vmem:[#allocation13 + $0x8] sm:$0xff] %v1131_v60 }
 0x32d   :  { %1147 = dma.vmem_to_hbm [thread:$0]  %s1140_s5, 256, %s1142_s14, [#allocation4], %s1842_s15, %s1842_s15, %s1843_s16  }
 0x32e   :  { %1830 = dma.done.wait [#allocation4], 256  }
 0x32f   :  { %1831 = vsyncadd [#allocation4], 4294967040 }
 0x330   :  { %1152 = vsyncpa [#allocation3], 1 }
 0x331   :  { %1153 = vsyncpa [#allocation6], 1 }
 0x332   :  { %1154 = vsyncpa [#allocation9], 1 }
 0x333   :  { %1155 = vsyncpa [#allocation12], 1 }
 0x334   :  { %1156 = vsyncpa [#allocation4], 1 }

</bundles_post_ra>
